<compile_context>
chip_gen: v7x
topology: tpu7x:2x2x1
jax: 0.10.0
libtpu: 0.0.40
codegen_flags: <defaults>
</compile_context>

<pallas_src>
import functools

import jax
import jax.numpy as jnp
from jax.experimental import pallas as pl
from jax.experimental.pallas import tpu as pltpu


# ---------------------------------------------------------------------------
# Kernel
# ---------------------------------------------------------------------------
def linkpred_kernel(xi_ref, xj_ref,
                    w0_ref, b0_ref,
                    w1_ref, b1_ref,
                    w2_ref, b2_ref,
                    o_ref, *, last_is_reduce):
    # Hadamard product of the two node embeddings, always in f32: the kernel is
    # HBM-DMA bound, so the extra VPU casts are free and this removes one of
    # the compounded bf16 roundings when streaming bf16.
    x = xi_ref[...].astype(jnp.float32) * xj_ref[...].astype(jnp.float32)

    # layer 0: Linear(in -> hidden) + ReLU.  MXU accumulates in f32.
    h = jnp.dot(x.astype(w0_ref.dtype), w0_ref[...],
                preferred_element_type=jnp.float32) + b0_ref[...]
    h = jnp.maximum(h, 0.0)
    # TODO(synk): dropout is a no-op in eval mode (training=False); not implemented.

    # layer 1: Linear(hidden -> hidden) + ReLU.
    h = jnp.dot(h.astype(w1_ref.dtype), w1_ref[...],
                preferred_element_type=jnp.float32) + b1_ref[...]
    h = jnp.maximum(h, 0.0)

    # layer 2: Linear(hidden -> out) + sigmoid.
    if last_is_reduce:
        # out_channels == 1: a degenerate N=1 MXU pass wastes the systolic
        # array and still pays full push/pop latency.  Do it on VPU (multiply)
        # + XLU (lane reduce); w2 is passed as a (1, hidden) row vector.
        z = jnp.sum(h * w2_ref[...].astype(jnp.float32), axis=-1, keepdims=True)
        z = z + b2_ref[...]
    else:
        z = jnp.dot(h.astype(w2_ref.dtype), w2_ref[...],
                    preferred_element_type=jnp.float32) + b2_ref[...]

    o_ref[...] = jax.nn.sigmoid(z).astype(o_ref.dtype)


# ---------------------------------------------------------------------------
# Tuning helpers
# ---------------------------------------------------------------------------
def _round_up(x, m):
    return ((x + m - 1) // m) * m


def _chip_tuning():
    """Returns (target HBM bytes per grid step, VMEM budget bytes, #TensorCores)."""
    try:
        kind = jax.devices()[0].device_kind.lower()
    except Exception:
        kind = ""
    if ("v5 lite" in kind) or ("v5lite" in kind) or ("v5e" in kind):
        # ~0.82 TB/s HBM: ~2 MiB/step already amortizes the ~0.35 us overhead.
        return 2 << 20, 32 << 20, 1
    if ("v6" in kind) or ("trillium" in kind):
        # ~1.4 TB/s HBM, 128 MiB VMEM.
        return 4 << 20, 40 << 20, 1
    if ("v7" in kind) or ("tpu7" in kind):
        # ~3.2 TB/s HBM, but only 64 MiB VMEM per TC and 2 TCs per chip.
        return 8 << 20, 32 << 20, 2
    # Unknown chip: conservative budget, assume possibly-megacore.
    return 4 << 20, 24 << 20, 2


# ---------------------------------------------------------------------------
# Wrapper
# ---------------------------------------------------------------------------
def link_predictor(x_i, x_j, params, *, tm=None, stream_dtype=jnp.bfloat16,
                   input_buffers=2):
    """params = [(W_in_hid, b), (W_hid_hid, b), (W_hid_out, b)],
    each W pre-transposed to (in_features, out_features), each b shaped (1, out).

    stream_dtype: dtype x_i/x_j and the weights are streamed in (default bf16
    halves HBM read traffic); accumulation / biases / activations stay f32.
    tm: row-tile override; None -> auto-picked per chip generation.
    input_buffers: >2 enables deeper pipelining on the x_i/x_j streams.
    """
    N, in_dim = x_i.shape
    (w0, b0), (w1, b1), (w2, b2) = params
    hidden = w1.shape[1]
    out_dim = w2.shape[1]
    last_is_reduce = (out_dim == 1)

    if stream_dtype is not None:
        x_i = x_i.astype(stream_dtype)
        x_j = x_j.astype(stream_dtype)
        w0 = w0.astype(stream_dtype)
        w1 = w1.astype(stream_dtype)
        w2 = w2.astype(stream_dtype)
    elt_bytes = jnp.dtype(x_i.dtype).itemsize

    # (hidden, 1) column -> (1, hidden) row for the VPU-reduce final layer.
    w2_arg = w2.reshape(1, hidden) if last_is_reduce else w2

    # Sublane tile of the streaming dtype.
    sub = 16 if x_i.dtype == jnp.bfloat16 else 8

    step_bytes, vmem_budget, num_cores = _chip_tuning()

    # Per-row VMEM footprint model: double/multi-buffered inputs + double-
    # buffered output + f32 intermediates; plus resident (double-buffered)
    # weights/biases.
    bufs = max(2, int(input_buffers))
    per_row_vmem = (2 * bufs * in_dim * elt_bytes        # x_i, x_j tiles
                    + 2 * out_dim * 4                    # output tile
                    + in_dim * 4 + 3 * hidden * 4 + 2 * out_dim * 4)  # f32 temps
    weight_bytes = 2 * ((in_dim * hidden + hidden * hidden + hidden * out_dim)
                        * elt_bytes + (2 * hidden + out_dim) * 4)

    if tm is None:
        per_row_hbm = 2 * in_dim * elt_bytes             # x_i + x_j reads dominate
        tm = step_bytes // per_row_hbm                   # amortize ~0.35us/step
        tm = min(tm, max(sub, (vmem_budget - weight_bytes) // per_row_vmem))
        if num_cores >= 2:
            # Keep >= 2*num_cores grid steps so ("parallel",) can shard row
            # tiles across TensorCores (v7x); harmless when N is small.
            tm = min(tm, _round_up(-(-N // (2 * num_cores)), sub))
    tm = max(sub, (int(tm) // sub) * sub)
    tm = min(tm, _round_up(N, sub))

    grid = (pl.cdiv(N, tm),)   # cdiv: trailing N % tm rows are handled, not dropped

    footprint = tm * per_row_vmem + weight_bytes
    vmem_limit = int(min(48 << 20, max(footprint + (8 << 20), 32 << 20)))

    def x_spec():
        if bufs > 2:
            return pl.BlockSpec((tm, in_dim), lambda i: (i, 0),
                                pipeline_mode=pl.Buffered(bufs))
        return pl.BlockSpec((tm, in_dim), lambda i: (i, 0))

    full = lambda arr: pl.BlockSpec(arr.shape, lambda i: (0, 0))  # resident params

    # Advisory cost: bandwidth-bound custom call.
    flops = N * (in_dim + 2 * in_dim * hidden + 2 * hidden * hidden
                 + 2 * hidden * out_dim + 2 * hidden + out_dim)
    bytes_accessed = (N * (2 * in_dim * elt_bytes + out_dim * 4)
                      + (in_dim * hidden + hidden * hidden + hidden * out_dim)
                      * elt_bytes + (2 * hidden + out_dim) * 4)
    cost = pl.CostEstimate(flops=int(flops),
                           transcendentals=int(N * out_dim),
                           bytes_accessed=int(bytes_accessed))

    kernel = functools.partial(linkpred_kernel, last_is_reduce=last_is_reduce)

    return pl.pallas_call(
        kernel,
        out_shape=jax.ShapeDtypeStruct((N, out_dim), jnp.float32),
        grid_spec=pltpu.PrefetchScalarGridSpec(
            num_scalar_prefetch=0,
            grid=grid,
            in_specs=[
                x_spec(),            # x_i row tile
                x_spec(),            # x_j row tile
                full(w0), full(b0),
                full(w1), full(b1),
                full(w2_arg), full(b2),
            ],
            out_specs=pl.BlockSpec((tm, out_dim), lambda i: (i, 0)),
        ),
        compiler_params=pltpu.CompilerParams(
            dimension_semantics=("parallel",),   # row tiles shard across TCs (v7x)
            vmem_limit_bytes=vmem_limit),
        cost_estimate=cost,
    )(x_i, x_j, w0, b0, w1, b1, w2_arg, b2)


# ---------------------------------------------------------------------------
# Reference / init
# ---------------------------------------------------------------------------
def init_params(key, in_channels, hidden_channels, out_channels, num_layers):
    """Deterministic synthetic init mirroring the module's layer shapes.
    Weights stored pre-transposed (in, out); biases (1, out)."""
    dims = [in_channels] + [hidden_channels] * (num_layers - 1) + [out_channels]
    params = []
    for li in range(num_layers):
        k_w, k_b, key = jax.random.split(key, 3)
        fan_in, fan_out = dims[li], dims[li + 1]
        bound = 1.0 / jnp.sqrt(fan_in)
        w = jax.random.uniform(k_w, (fan_in, fan_out), jnp.float32, -bound, bound)
        b = jax.random.uniform(k_b, (1, fan_out), jnp.float32, -bound, bound)
        params.append((w, b))
    return params


def ref_fwd(x_i, x_j, params):
    x = x_i * x_j
    (w0, b0), (w1, b1), (w2, b2) = params
    x = jnp.maximum(x @ w0 + b0, 0.0)
    x = jnp.maximum(x @ w1 + b1, 0.0)
    return jax.nn.sigmoid(x @ w2 + b2)


if __name__ == "__main__":
    # Shapes consistent with the module: num_layers=3, out_channels=1.
    # N deliberately NOT a multiple of any tile to exercise the cdiv grid.
    N = 1000
    in_channels = 64
    hidden_channels = 32
    out_channels = 1
    num_layers = 3

    key = jax.random.PRNGKey(0)
    k_i, k_j, k_p = jax.random.split(key, 3)
    x_i = jax.random.normal(k_i, (N, in_channels), jnp.float32)
    x_j = jax.random.normal(k_j, (N, in_channels), jnp.float32)
    params = init_params(k_p, in_channels, hidden_channels, out_channels, num_layers)

    ref = ref_fwd(x_i, x_j, params)

    # f32 streaming path (bit-faithful to the PyTorch eval forward).
    out_f32 = link_predictor(x_i, x_j, params, stream_dtype=jnp.float32)
    jax.block_until_ready(out_f32)
    assert out_f32.shape == (N, out_channels)
    assert jnp.allclose(out_f32, ref, atol=1e-5, rtol=1e-5)

    # Default path: bf16 streaming (halves HBM read traffic); f32 Hadamard,
    # accumulation and activations.  Tolerance tightened vs. previous version
    # now that the Hadamard product is computed in f32.
    out_bf16 = link_predictor(x_i, x_j, params)
    jax.block_until_ready(out_bf16)
    assert out_bf16.shape == (N, out_channels)
    assert bool(jnp.all(jnp.isfinite(out_bf16)))
    assert jnp.allclose(out_bf16, ref, atol=2e-2)

    print("KERNEL_OK")
</pallas_src>

<mosaic_0001>
module attributes {stable_mosaic.version = 11 : i64} {
  func.func @linkpred_kernel(%arg0: i32, %arg1: memref<256x64xf32, #tpu.memory_space<vmem>>, %arg2: memref<256x64xf32, #tpu.memory_space<vmem>>, %arg3: memref<64x32xf32, #tpu.memory_space<vmem>>, %arg4: memref<1x32xf32, #tpu.memory_space<vmem>>, %arg5: memref<32x32xf32, #tpu.memory_space<vmem>>, %arg6: memref<1x32xf32, #tpu.memory_space<vmem>>, %arg7: memref<1x32xf32, #tpu.memory_space<vmem>>, %arg8: memref<1x1xf32, #tpu.memory_space<vmem>>, %arg9: memref<256x1xf32, #tpu.memory_space<vmem>>) attributes {dimension_semantics = [#tpu.dimension_semantics<parallel>], iteration_bounds = array<i64: 4>, scalar_prefetch = 0 : i64, scratch_operands = 0 : i64, tpu.core_type = #tpu.core_type<tc>, window_params = [{transform_indices = @transform_0, window_bounds = array<i64: 256, 64>}, {transform_indices = @transform_1, window_bounds = array<i64: 256, 64>}, {pipeline_mode = #tpu.pipeline_mode<synchronous>, transform_indices = @transform_2, window_bounds = array<i64: 64, 32>}, {pipeline_mode = #tpu.pipeline_mode<synchronous>, transform_indices = @transform_3, window_bounds = array<i64: 1, 32>}, {pipeline_mode = #tpu.pipeline_mode<synchronous>, transform_indices = @transform_4, window_bounds = array<i64: 32, 32>}, {pipeline_mode = #tpu.pipeline_mode<synchronous>, transform_indices = @transform_5, window_bounds = array<i64: 1, 32>}, {pipeline_mode = #tpu.pipeline_mode<synchronous>, transform_indices = @transform_6, window_bounds = array<i64: 1, 32>}, {pipeline_mode = #tpu.pipeline_mode<synchronous>, transform_indices = @transform_7, window_bounds = array<i64: 1, 1>}, {transform_indices = @transform_8, window_bounds = array<i64: 256, 1>}]} {
    %c0 = arith.constant 0 : index
    %c0_0 = arith.constant 0 : index
    %0 = vector.load %arg1[%c0, %c0_0] : memref<256x64xf32, #tpu.memory_space<vmem>>, vector<256x64xf32>
    %c0_1 = arith.constant 0 : index
    %c0_2 = arith.constant 0 : index
    %1 = vector.load %arg2[%c0_1, %c0_2] : memref<256x64xf32, #tpu.memory_space<vmem>>, vector<256x64xf32>
    %2 = arith.mulf %0, %1 : vector<256x64xf32>
    %c0_3 = arith.constant 0 : index
    %c0_4 = arith.constant 0 : index
    %3 = vector.load %arg3[%c0_3, %c0_4] : memref<64x32xf32, #tpu.memory_space<vmem>>, vector<64x32xf32>
    %cst = arith.constant dense<0.000000e+00> : vector<256x32xf32>
    %4 = tpu.matmul %2, %3, %cst {dimension_numbers = #tpu.dot_dimension_numbers<[1], [0], [0], [1], [0, 0, 1, 1], [], []>} : vector<256x64xf32>, vector<64x32xf32>, vector<256x32xf32> -> vector<256x32xf32>
    %c0_5 = arith.constant 0 : index
    %c0_6 = arith.constant 0 : index
    %5 = vector.load %arg4[%c0_5, %c0_6] : memref<1x32xf32, #tpu.memory_space<vmem>>, vector<1x32xf32>
    %6 = vector.broadcast %5 : vector<1x32xf32> to vector<256x32xf32>
    %7 = arith.addf %4, %6 : vector<256x32xf32>
    %cst_7 = arith.constant 0.000000e+00 : f32
    %8 = vector.broadcast %cst_7 : f32 to vector<256x32xf32>
    %9 = arith.maximumf %7, %8 : vector<256x32xf32>
    %c0_8 = arith.constant 0 : index
    %c0_9 = arith.constant 0 : index
    %10 = vector.load %arg5[%c0_8, %c0_9] : memref<32x32xf32, #tpu.memory_space<vmem>>, vector<32x32xf32>
    %cst_10 = arith.constant dense<0.000000e+00> : vector<256x32xf32>
    %11 = tpu.matmul %9, %10, %cst_10 {dimension_numbers = #tpu.dot_dimension_numbers<[1], [0], [0], [1], [0, 0, 1, 1], [], []>} : vector<256x32xf32>, vector<32x32xf32>, vector<256x32xf32> -> vector<256x32xf32>
    %c0_11 = arith.constant 0 : index
    %c0_12 = arith.constant 0 : index
    %12 = vector.load %arg6[%c0_11, %c0_12] : memref<1x32xf32, #tpu.memory_space<vmem>>, vector<1x32xf32>
    %13 = vector.broadcast %12 : vector<1x32xf32> to vector<256x32xf32>
    %14 = arith.addf %11, %13 : vector<256x32xf32>
    %cst_13 = arith.constant 0.000000e+00 : f32
    %15 = vector.broadcast %cst_13 : f32 to vector<256x32xf32>
    %16 = arith.maximumf %14, %15 : vector<256x32xf32>
    %c0_14 = arith.constant 0 : index
    %c0_15 = arith.constant 0 : index
    %17 = vector.load %arg7[%c0_14, %c0_15] : memref<1x32xf32, #tpu.memory_space<vmem>>, vector<1x32xf32>
    %18 = vector.broadcast %17 : vector<1x32xf32> to vector<256x32xf32>
    %19 = arith.mulf %16, %18 : vector<256x32xf32>
    %cst_16 = arith.constant dense<0.000000e+00> : vector<256xf32>
    %20 = vector.multi_reduction <add>, %19, %cst_16 [1] : vector<256x32xf32> to vector<256xf32>
    %21 = vector.shape_cast %20 : vector<256xf32> to vector<256x1xf32>
    %c0_17 = arith.constant 0 : index
    %c0_18 = arith.constant 0 : index
    %22 = vector.load %arg8[%c0_17, %c0_18] : memref<1x1xf32, #tpu.memory_space<vmem>>, vector<1x1xf32>
    %23 = vector.broadcast %22 : vector<1x1xf32> to vector<256x1xf32>
    %24 = arith.addf %21, %23 : vector<256x1xf32>
    %25 = arith.negf %24 : vector<256x1xf32>
    %26 = math.exp %25 : vector<256x1xf32>
    %cst_19 = arith.constant 1.000000e+00 : f32
    %27 = vector.broadcast %cst_19 : f32 to vector<256x1xf32>
    %28 = arith.addf %27, %26 : vector<256x1xf32>
    %29 = arith.divf %27, %28 : vector<256x1xf32>
    %c0_20 = arith.constant 0 : index
    %c0_21 = arith.constant 0 : index
    %30 = vector.load %arg9[%c0_20, %c0_21] : memref<256x1xf32, #tpu.memory_space<vmem>>, vector<256x1xf32>
    tpu.vector_store %arg9[%c0_20, %c0_21], %29 {strides = array<i32>} : memref<256x1xf32, #tpu.memory_space<vmem>>, vector<256x1xf32>,
    return
  }
  func.func @transform_0(%arg0: i32) -> (i32, i32) {
    %c0_i32 = arith.constant 0 : i32
    %c0_i32_0 = arith.constant 0 : i32
    return %arg0, %c0_i32 : i32, i32
  }
  func.func @transform_1(%arg0: i32) -> (i32, i32) {
    %c0_i32 = arith.constant 0 : i32
    %c0_i32_0 = arith.constant 0 : i32
    return %arg0, %c0_i32 : i32, i32
  }
  func.func @transform_2(%arg0: i32) -> (i32, i32) {
    %c0_i32 = arith.constant 0 : i32
    %c0_i32_0 = arith.constant 0 : i32
    %c0_i32_1 = arith.constant 0 : i32
    return %c0_i32, %c0_i32_0 : i32, i32
  }
  func.func @transform_3(%arg0: i32) -> (i32, i32) {
    %c0_i32 = arith.constant 0 : i32
    %c0_i32_0 = arith.constant 0 : i32
    %c0_i32_1 = arith.constant 0 : i32
    return %c0_i32, %c0_i32_0 : i32, i32
  }
  func.func @transform_4(%arg0: i32) -> (i32, i32) {
    %c0_i32 = arith.constant 0 : i32
    %c0_i32_0 = arith.constant 0 : i32
    %c0_i32_1 = arith.constant 0 : i32
    return %c0_i32, %c0_i32_0 : i32, i32
  }
  func.func @transform_5(%arg0: i32) -> (i32, i32) {
    %c0_i32 = arith.constant 0 : i32
    %c0_i32_0 = arith.constant 0 : i32
    %c0_i32_1 = arith.constant 0 : i32
    return %c0_i32, %c0_i32_0 : i32, i32
  }
  func.func @transform_6(%arg0: i32) -> (i32, i32) {
    %c0_i32 = arith.constant 0 : i32
    %c0_i32_0 = arith.constant 0 : i32
    %c0_i32_1 = arith.constant 0 : i32
    return %c0_i32, %c0_i32_0 : i32, i32
  }
  func.func @transform_7(%arg0: i32) -> (i32, i32) {
    %c0_i32 = arith.constant 0 : i32
    %c0_i32_0 = arith.constant 0 : i32
    %c0_i32_1 = arith.constant 0 : i32
    return %c0_i32, %c0_i32_0 : i32, i32
  }
  func.func @transform_8(%arg0: i32) -> (i32, i32) {
    %c0_i32 = arith.constant 0 : i32
    %c0_i32_0 = arith.constant 0 : i32
    return %arg0, %c0_i32 : i32, i32
  }
}

</mosaic_0001>

<bundles_post_ra>
// kernel: tpu_custom_call.1
= control target key start
LH: loop header
LB: loop body
LE: loop exit
PB: predicated region body
PF: predicated region fallthrough
CT: control target
= control target key end

     0   :  { %s3252_s0 = inlined_call_operand.vmem [shape: f32[1000,64], index: 0, kind: input, shape index: {}]   ;;  %s3253_s1 = inlined_call_operand.vmem [shape: f32[1000,64], index: 1, kind: input, shape index: {}]   ;;  %s3254_s2 = inlined_call_operand.vmem [shape: f32[64,32], index: 2, kind: input, shape index: {}]   ;;  %s3255_s3 = inlined_call_operand.vmem [shape: f32[1,32], index: 3, kind: input, shape index: {}]   ;;  %s3256_s4 = inlined_call_operand.vmem [shape: f32[32,32], index: 4, kind: input, shape index: {}]   ;;  %s3257_s5 = inlined_call_operand.vmem [shape: f32[1,32], index: 5, kind: input, shape index: {}]   ;;  %s3258_s6 = inlined_call_operand.vmem [shape: f32[1,32], index: 6, kind: input, shape index: {}]   ;;  %s3259_s7 = inlined_call_operand.<no memory space> [shape: f32[1,1], index: 7, kind: input, shape index: {}]   ;;  %s3260_s8 = inlined_call_operand.vmem [shape: f32[1000,1], index: 8, kind: output, shape index: {}]  }
   0x1   :  { %v13_v0 = vstv %s3259_s7 }
   0x2   :  { %14 = vst [vmem:[#allocation2] sm:$0x1] %v13_v0 }
   0x3   :  { %s2652_s29 = smov 0   ;;  %s2654_s30 = smov 0  }
   0x4   :  { %s2656_s9 = smov 0  }
   0x5 LB: > { %s2665_s7 = sadd.s32 4294967295, %s2570_s9   ;;  %s2667_s10 = sadd.s32 1, %s2570_s9   ;;  %s2570_s9 = sphi %s2656_s9, %s3269_s9   ;;  %s2566_s30 = sphi %s2654_s30, %s3268_s30   ;;  %s2562_s29 = sphi %s2652_s29, %s3267_s29  }
   0x6   : > { %s202_s11 = ssub.s32 %s2570_s9, %s2667_s10  ;;  %s205_s12 = sadd.s32 1, %s2566_s30 }
   0x7   : > { %p203_p0 = scmp.eq.s32.totalorder %s202_s11, 0  ;;  %p215_p1 = scmp.ne.s32.totalorder %s2566_s30, %s2562_s29 }
   0x8   : > { %p216_p2 = scmp.eq.s32.totalorder %s2665_s7, 3  ;;  %p1954_p3 = scmp.ge.s32.totalorder %s2570_s9, 1 }
   0x9   : > { %s2675_s13 = scalar_select %p203_p0, %s2566_s30, %s205_s12  }
   0xa   : > { %p2677_p4 = por %p216_p2, %p215_p1  ;;  %p292_p5 = scmp.lt.s32.totalorder %s2570_s9, 5 }
   0xc   : > { %p293_p6 = pnand %p1954_p3, %p292_p5 }
   0xd   : > { %v467_v1 = vld [vmem:[%s3254_s2] sm:$0xff] (!%p293_p6)  ;;  %v468_v2 = vld [vmem:[%s3254_s2 + $0x8] sm:$0xff] (!%p293_p6)  ;;  %v469_v3 = vld [vmem:[%s3254_s2 + $0x10] sm:$0xff] (!%p293_p6)  ;;  %s2691_s21 = sshll.u32 (!%p293_p6), %s2665_s7, 5  ;;  %vm482_vm0 = vcmask (!%p293_p6), 523264   ;;  %vm847_vm1 = vcmask (!%p293_p6), 261120  }
   0xe   : > { %296 = sbr.rel (%p293_p6) target bundleno = 762 (0x2fa), region = 52  ;;  %v2276_v4 = vpack.c.bf16 (!%p293_p6), %v468_v2, %v467_v1  ;;  %v470_v5 = vld [vmem:[%s3254_s2 + $0x18] sm:$0xff] (!%p293_p6)  ;;  %p343_p7 = scmp.lt.s32.totalorder (!%p293_p6), %s2691_s21, 124  ;;  %v471_v7 = vld [vmem:[%s3254_s2 + $0x20] sm:$0xff] (!%p293_p6)  ;;  %v472_v8 = vld [vmem:[%s3254_s2 + $0x28] sm:$0xff] (!%p293_p6)  ;;  %vm1567_vm2 = vcmask (!%p293_p6), 7168  }
   0xf   : > { %v2280_v6 = vpack.c.bf16 (!%p293_p6), %v470_v5, %v469_v3  ;;  %v836_v9 = vld [vmem:[%s3256_s4] sm:$0xff] (!%p293_p6)  ;;  %v837_v10 = vld [vmem:[%s3256_s4 + $0x8] sm:$0xff] (!%p293_p6)  ;;  %v2284_v12 = vpack.c.bf16 (!%p293_p6), %v472_v8, %v471_v7  ;;  %v473_v13 = vld [vmem:[%s3254_s2 + $0x30] sm:$0xff] (!%p293_p6)  ;;  %s335_s22 = sand.u32 (!%p293_p6), 1, %s2562_s29  }
  0x10   : > { %2277 = vmatprep.subr.bf16.mxu0 (!%p293_p6), %v2276_v4  ;;  %v2292_v11 = vpack.c.bf16 (!%p293_p6), %v837_v10, %v836_v9  ;;  %v474_v14 = vld [vmem:[%s3254_s2 + $0x38] sm:$0xff] (!%p293_p6)  ;;  %s1955_s23 = sshll.u32 (!%p293_p6), %s335_s22, 8 }
  0x11   : > { %2279 = vmatpush3.bf16.msra.mxu0 (!%p293_p6), %v2276_v4  ;;  %v2288_v18 = vpack.c.bf16 (!%p293_p6), %v474_v14, %v473_v13  ;;  %s3028_s29 = scalar_lea.vmem (!%p293_p6), [#allocation3], %s1955_s23  }
  0x12   : > { %2281 = vmatprep.subr.bf16.mxu0 (!%p293_p6), %v2280_v6  ;;  %2293 = vmatprep.subr.bf16.mxu1 (!%p293_p6), %v2292_v11 }
  0x13   : > { %2295 = vmatpush3.bf16.msra.mxu1 (!%p293_p6), %v2292_v11 }
  0x15   : > { %s344_s11 = scalar_select %p343_p7, %s2691_s21, 124  ;;  %2283 = vmatpush3.bf16.msra.mxu0 %v2280_v6 }
  0x16   : > { %2285 = vmatprep.subr.bf16.mxu0 %v2284_v12  ;;  %s2077_s25 = sshll.u32 (%p2677_p4), %s2665_s7, 8 }
  0x17   : > { %s1957_s16 = sshll.u32 %s344_s11, 3  ;;  %s3120_s28 = scalar_lea.vmem (%p2677_p4), %s3260_s8, %s2077_s25  }
  0x18   : > { %s2719_s24 = scalar_lea.vmem %s3252_s0, %s1957_s16  ;;  %s2724_s27 = scalar_lea.vmem %s3253_s1, %s1957_s16 }
  0x19   : > { %v371_v15 = vld [vmem:[%s2719_s24] sm:$0xff]  ;;  %2287 = vmatpush3.bf16.msra.mxu0 %v2284_v12  ;;  %v372_v19 = vld [vmem:[%s2719_s24 + $0x8] sm:$0xff]  ;;  %v373_v21 = vld [vmem:[%s2719_s24 + $0x10] sm:$0xff] }
  0x1a   : > { %v403_v16 = vld [vmem:[%s2724_s27] sm:$0xff]  ;;  %v404_v20 = vld [vmem:[%s2724_s27 + $0x8] sm:$0xff]  ;;  %2289 = vmatprep.subr.bf16.mxu0 %v2288_v18  ;;  %v405_v22 = vld [vmem:[%s2724_s27 + $0x10] sm:$0xff] }
  0x1b   : > { %v435_v17 = vmul.f32 %v403_v16, %v371_v15  ;;  %v436_v23 = vmul.f32 %v404_v20, %v372_v19  ;;  %v437_v24 = vmul.f32 %v405_v22, %v373_v21  ;;  %v374_v25 = vld [vmem:[%s2719_s24 + $0x18] sm:$0xff]  ;;  %v375_v27 = vld [vmem:[%s2719_s24 + $0x20] sm:$0xff]  ;;  %v376_v31 = vld [vmem:[%s2719_s24 + $0x28] sm:$0xff] }
  0x1c   : > { %v406_v26 = vld [vmem:[%s2724_s27 + $0x18] sm:$0xff]  ;;  %v407_v28 = vld [vmem:[%s2724_s27 + $0x20] sm:$0xff]  ;;  %v408_v32 = vld [vmem:[%s2724_s27 + $0x28] sm:$0xff] }
  0x1d   : > { %2172 = vmatprep.mubr.msk.f32.mxu0 %vm482_vm0, %v435_v17  ;;  %2291 = vmatpush3.bf16.msra.mxu0 %v2288_v18  ;;  %v438_v29 = vmul.f32 %v406_v26, %v374_v25  ;;  %v439_v30 = vmul.f32 %v407_v28, %v375_v27  ;;  %v377_v33 = vld [vmem:[%s2719_s24 + $0x30] sm:$0xff]  ;;  %v440_v35 = vmul.f32 %v408_v32, %v376_v31  ;;  %v378_v37 = vld [vmem:[%s2719_s24 + $0x38] sm:$0xff]  ;;  %v379_v39 = vld [vmem:[%s2719_s24 + $0x40] sm:$0xff] }
  0x1e   : > { %v409_v34 = vld [vmem:[%s2724_s27 + $0x30] sm:$0xff]  ;;  %v410_v38 = vld [vmem:[%s2724_s27 + $0x38] sm:$0xff]  ;;  %v411_v40 = vld [vmem:[%s2724_s27 + $0x40] sm:$0xff] }
  0x1f   : > { %v441_v36 = vmul.f32 %v409_v34, %v377_v33  ;;  %v400_v41 = vld [vmem:[%s2719_s24 + $0xe8] sm:$0xff]  ;;  %v442_v43 = vmul.f32 %v410_v38, %v378_v37  ;;  %v401_v45 = vld [vmem:[%s2719_s24 + $0xf0] sm:$0xff]  ;;  %v402_v47 = vld [vmem:[%s2719_s24 + $0xf8] sm:$0xff]  ;;  %v443_v48 = vmul.f32 %v411_v40, %v379_v39 }
  0x20   : > { %2173 = vmatmul.mubr.msk.f32.vlgmr.msra.gmra.mrb[0].mxu0 %vm482_vm0, %v436_v23  ;;  %v432_v42 = vld [vmem:[%s2724_s27 + $0xe8] sm:$0xff]  ;;  %v433_v46 = vld [vmem:[%s2724_s27 + $0xf0] sm:$0xff]  ;;  %v434_v52 = vld [vmem:[%s2724_s27 + $0xf8] sm:$0xff] }
  0x21   : > { %2175 = vmatprep.mubr.msk.f32.mxu0 %vm482_vm0, %v437_v24  ;;  %v2752_v44 = vmul.f32 %v432_v42, %v400_v41  ;;  %v380_v49 = vld [vmem:[%s2719_s24 + $0x48] sm:$0xff]  ;;  %v2760_v51 = vmul.f32 %v433_v46, %v401_v45  ;;  %v381_v53 = vld [vmem:[%s2719_s24 + $0x50] sm:$0xff]  ;;  %v2765_v55 = vmul.f32 %v434_v52, %v402_v47  ;;  %v382_v58 = vld [vmem:[%s2719_s24 + $0x58] sm:$0xff] }
  0x22   : > { %v412_v50 = vld [vmem:[%s2724_s27 + $0x48] sm:$0xff]  ;;  %v413_v54 = vld [vmem:[%s2724_s27 + $0x50] sm:$0xff]  ;;  %v414_v59 = vld [vmem:[%s2724_s27 + $0x58] sm:$0xff] }
  0x23   : > { %v444_v56 = vmul.f32 %v412_v50, %v380_v49  ;;  %v445_v57 = vmul.f32 %v413_v54, %v381_v53  ;;  %v383_v60 = vld [vmem:[%s2719_s24 + $0x60] sm:$0xff]  ;;  %v446_v62 = vmul.f32 %v414_v59, %v382_v58  ;;  %v384_v0 = vld [vmem:[%s2719_s24 + $0x68] sm:$0xff]  ;;  %v385_v2 = vld [vmem:[%s2719_s24 + $0x70] sm:$0xff] }
  0x24   : > { %2176 = vmatmul.mubr.msk.f32.gmra.mrb[2].mxu0 %vm482_vm0, %v438_v29  ;;  %v415_v61 = vld [vmem:[%s2724_s27 + $0x60] sm:$0xff]  ;;  %v416_v1 = vld [vmem:[%s2724_s27 + $0x68] sm:$0xff]  ;;  %v417_v3 = vld [vmem:[%s2724_s27 + $0x70] sm:$0xff] }
  0x25   : > { %2178 = vmatprep.mubr.msk.f32.mxu0 %vm482_vm0, %v439_v30  ;;  %v447_v63 = vmul.f32 %v415_v61, %v383_v60  ;;  %v448_v4 = vmul.f32 %v416_v1, %v384_v0  ;;  %v449_v5 = vmul.f32 %v417_v3, %v385_v2  ;;  %v386_v6 = vld [vmem:[%s2719_s24 + $0x78] sm:$0xff]  ;;  %v387_v8 = vld [vmem:[%s2719_s24 + $0x80] sm:$0xff]  ;;  %v388_v12 = vld [vmem:[%s2719_s24 + $0x88] sm:$0xff] }
  0x26   : > { %v418_v7 = vld [vmem:[%s2724_s27 + $0x78] sm:$0xff]  ;;  %v419_v9 = vld [vmem:[%s2724_s27 + $0x80] sm:$0xff]  ;;  %v420_v13 = vld [vmem:[%s2724_s27 + $0x88] sm:$0xff] }
  0x27   : > { %v450_v10 = vmul.f32 %v418_v7, %v386_v6  ;;  %v451_v11 = vmul.f32 %v419_v9, %v387_v8  ;;  %v389_v14 = vld [vmem:[%s2719_s24 + $0x90] sm:$0xff]  ;;  %v452_v16 = vmul.f32 %v420_v13, %v388_v12  ;;  %v390_v18 = vld [vmem:[%s2719_s24 + $0x98] sm:$0xff]  ;;  %v391_v20 = vld [vmem:[%s2719_s24 + $0xa0] sm:$0xff] }
  0x28   : > { %2179 = vmatmul.mubr.msk.f32.gmra.mrb[4].mxu0 %vm482_vm0, %v440_v35  ;;  %v421_v15 = vld [vmem:[%s2724_s27 + $0x90] sm:$0xff]  ;;  %v422_v19 = vld [vmem:[%s2724_s27 + $0x98] sm:$0xff]  ;;  %v423_v21 = vld [vmem:[%s2724_s27 + $0xa0] sm:$0xff] }
  0x29   : > { %2181 = vmatprep.mubr.msk.f32.mxu0 %vm482_vm0, %v441_v36  ;;  %v453_v17 = vmul.f32 %v421_v15, %v389_v14  ;;  %v454_v22 = vmul.f32 %v422_v19, %v390_v18  ;;  %v455_v23 = vmul.f32 %v423_v21, %v391_v20  ;;  %v392_v24 = vld [vmem:[%s2719_s24 + $0xa8] sm:$0xff]  ;;  %v393_v26 = vld [vmem:[%s2719_s24 + $0xb0] sm:$0xff]  ;;  %v394_v30 = vld [vmem:[%s2719_s24 + $0xb8] sm:$0xff] }
  0x2a   : > { %v424_v25 = vld [vmem:[%s2724_s27 + $0xa8] sm:$0xff]  ;;  %v425_v27 = vld [vmem:[%s2724_s27 + $0xb0] sm:$0xff]  ;;  %v426_v31 = vld [vmem:[%s2724_s27 + $0xb8] sm:$0xff] }
  0x2b   : > { %v456_v28 = vmul.f32 %v424_v25, %v392_v24  ;;  %v457_v29 = vmul.f32 %v425_v27, %v393_v26  ;;  %v395_v32 = vld [vmem:[%s2719_s24 + $0xc0] sm:$0xff]  ;;  %v458_v34 = vmul.f32 %v426_v31, %v394_v30  ;;  %v396_v36 = vld [vmem:[%s2719_s24 + $0xc8] sm:$0xff]  ;;  %v397_v38 = vld [vmem:[%s2719_s24 + $0xd0] sm:$0xff] }
  0x2c   : > { %2182 = vmatmul.mubr.msk.f32.gmra.mrb[6].mxu0 %vm482_vm0, %v442_v43  ;;  %v427_v33 = vld [vmem:[%s2724_s27 + $0xc0] sm:$0xff]  ;;  %v428_v37 = vld [vmem:[%s2724_s27 + $0xc8] sm:$0xff]  ;;  %v429_v39 = vld [vmem:[%s2724_s27 + $0xd0] sm:$0xff] }
  0x2d   : > { %2184 = vmatprep.mubr.msk.f32.mxu0 %vm482_vm0, %v443_v48  ;;  %v459_v35 = vmul.f32 %v427_v33, %v395_v32  ;;  %v460_v40 = vmul.f32 %v428_v37, %v396_v36  ;;  %v461_v41 = vmul.f32 %v429_v39, %v397_v38  ;;  %v398_v42 = vld [vmem:[%s2719_s24 + $0xd8] sm:$0xff]  ;;  %v399_v45 = vld [vmem:[%s2719_s24 + $0xe0] sm:$0xff]  ;;  %v838_v49 = vld [vmem:[%s3256_s4 + $0x10] sm:$0xff]  ;;  %s1608_s24 = ssub.s32 (%p2677_p4), 125, %s2691_s21 }
  0x2e   : > { %v430_v43 = vld [vmem:[%s2724_s27 + $0xd8] sm:$0xff]  ;;  %v431_v46 = vld [vmem:[%s2724_s27 + $0xe0] sm:$0xff]  ;;  %p1609_p8 = scmp.lt.s32.totalorder (%p2677_p4), %s1608_s24, 32 }
  0x2f   : > { %v462_v47 = vmul.f32 %v430_v43, %v398_v42  ;;  %v463_v48 = vmul.f32 %v431_v46, %v399_v45  ;;  %v839_v50 = vld [vmem:[%s3256_s4 + $0x18] sm:$0xff] }
  0x30   : > { %2185 = vmatmul.mubr.msk.f32.gmra.mrb[8].mxu0 %vm482_vm0, %v444_v56  ;;  %v2296_v52 = vpack.c.bf16 %v839_v50, %v838_v49 }
  0x31   : > { %2187 = vmatprep.mubr.msk.f32.mxu0 %vm482_vm0, %v445_v57 }
  0x32   : > { %2297 = vmatprep.subr.bf16.mxu1 %v2296_v52 }
  0x33   : > { %2299 = vmatpush3.bf16.msra.mxu1 %v2296_v52 }
  0x34   : > { %2188 = vmatmul.mubr.msk.f32.gmra.mrb[10].mxu0 %vm482_vm0, %v446_v62 }
  0x35   : > { %2190 = vmatprep.mubr.msk.f32.mxu0 %vm482_vm0, %v447_v63 }
  0x38   : > { %2191 = vmatmul.mubr.msk.f32.gmra.mrb[12].mxu0 %vm482_vm0, %v448_v4 }
  0x39   : > { %2193 = vmatprep.mubr.msk.f32.mxu0 %vm482_vm0, %v449_v5 }
  0x3c   : > { %2194 = vmatmul.mubr.msk.f32.gmra.mrb[14].mxu0 %vm482_vm0, %v450_v10 }
  0x3d   : > { %2196 = vmatprep.mubr.msk.f32.mxu0 %vm482_vm0, %v451_v11 }
  0x40   : > { %2197 = vmatmul.mubr.msk.f32.gmra.mrb[16].mxu0 %vm482_vm0, %v452_v16 }
  0x41   : > { %2199 = vmatprep.mubr.msk.f32.mxu0 %vm482_vm0, %v453_v17 }
  0x44   : > { %2200 = vmatmul.mubr.msk.f32.gmra.mrb[18].mxu0 %vm482_vm0, %v454_v22 }
  0x45   : > { %2202 = vmatprep.mubr.msk.f32.mxu0 %vm482_vm0, %v455_v23 }
  0x48   : > { %2203 = vmatmul.mubr.msk.f32.gmra.mrb[20].mxu0 %vm482_vm0, %v456_v28 }
  0x49   : > { %2205 = vmatprep.mubr.msk.f32.mxu0 %vm482_vm0, %v457_v29 }
  0x4c   : > { %2206 = vmatmul.mubr.msk.f32.gmra.mrb[22].mxu0 %vm482_vm0, %v458_v34 }
  0x4d   : > { %2208 = vmatprep.mubr.msk.f32.mxu0 %vm482_vm0, %v459_v35 }
  0x50   : > { %2209 = vmatmul.mubr.msk.f32.gmra.mrb[24].mxu0 %vm482_vm0, %v460_v40 }
  0x51   : > { %2211 = vmatprep.mubr.msk.f32.mxu0 %vm482_vm0, %v461_v41 }
  0x54   : > { %2212 = vmatmul.mubr.msk.f32.gmra.mrb[26].mxu0 %vm482_vm0, %v462_v47 }
  0x55   : > { %2214 = vmatprep.mubr.msk.f32.mxu0 %vm482_vm0, %v463_v48 }
  0x58   : > { %2215 = vmatmul.mubr.msk.f32.gmra.mrb[28].mxu0 %vm482_vm0, %v2752_v44  ;;  %v2840_v44 = vld [vmem:[%s3255_s3] ss:$0 sm:$0xff] }
  0x59   : > { %2217 = vmatprep.mubr.msk.f32.mxu0 %vm482_vm0, %v2760_v51 }
  0x5c   : > { %2218 = vmatmul.mubr.msk.f32.gmra.mrb[30].mxu0 %vm482_vm0, %v2765_v55 }
  0xf3   : > { %v2174_v51 = vpop.f32.mrb[0].mxu0 }
  0xf4   : > { %v651_v53 = vadd.f32 %v2174_v51, %v2840_v44  ;;  %v645_v54 = vpop.f32.mrb[1].mxu0 }
  0xf5   : > { %v646_v55 = vadd.f32 %v2840_v44, %v645_v54 }
  0xf6   : > { %v805_v58 = vmax.f32 %v651_v53, 0.0 }
  0xf7   : > { %v804_v56 = vmax.f32 %v646_v55, 0.0  ;;  %v2177_v57 = vpop.f32.mrb[2].mxu0 }
  0xf8   : > { %v661_v59 = vadd.f32 %v2177_v57, %v2840_v44  ;;  %v655_v60 = vpop.f32.mrb[3].mxu0 }
  0xf9   : > { %v656_v61 = vadd.f32 %v2840_v44, %v655_v60  ;;  %2228 = vmatprep.mubr.msk.f32.mxu1 %vm847_vm1, %v804_v56 }
  0xfa   : > { %2229 = vmatmul.mubr.msk.f32.vlgmr.msra.gmra.mrb[0].mxu1 %vm847_vm1, %v805_v58  ;;  %v807_v0 = vmax.f32 %v661_v59, 0.0 }
  0xfb   : > { %v806_v62 = vmax.f32 %v656_v61, 0.0  ;;  %v2180_v63 = vpop.f32.mrb[4].mxu0 }
  0xfc   : > { %v671_v1 = vadd.f32 %v2180_v63, %v2840_v44  ;;  %v665_v2 = vpop.f32.mrb[5].mxu0 }
  0xfd   : > { %v666_v3 = vadd.f32 %v2840_v44, %v665_v2  ;;  %2231 = vmatprep.mubr.msk.f32.mxu1 %vm847_vm1, %v806_v62 }
  0xfe   : > { %v809_v4 = vmax.f32 %v671_v1, 0.0  ;;  %2232 = vmatmul.mubr.msk.f32.gmra.mrb[2].mxu1 %vm847_vm1, %v807_v0 }
  0xff   : > { %v808_v5 = vmax.f32 %v666_v3, 0.0  ;;  %v2183_v6 = vpop.f32.mrb[6].mxu0 }
 0x100   : > { %v681_v7 = vadd.f32 %v2183_v6, %v2840_v44  ;;  %v675_v8 = vpop.f32.mrb[7].mxu0 }
 0x101   : > { %v676_v9 = vadd.f32 %v2840_v44, %v675_v8  ;;  %2234 = vmatprep.mubr.msk.f32.mxu1 %vm847_vm1, %v808_v5 }
 0x102   : > { %v811_v10 = vmax.f32 %v681_v7, 0.0  ;;  %2235 = vmatmul.mubr.msk.f32.gmra.mrb[4].mxu1 %vm847_vm1, %v809_v4 }
 0x103   : > { %v810_v11 = vmax.f32 %v676_v9, 0.0  ;;  %v2186_v12 = vpop.f32.mrb[8].mxu0 }
 0x104   : > { %v691_v13 = vadd.f32 %v2186_v12, %v2840_v44  ;;  %v685_v14 = vpop.f32.mrb[9].mxu0 }
 0x105   : > { %v686_v15 = vadd.f32 %v2840_v44, %v685_v14  ;;  %2237 = vmatprep.mubr.msk.f32.mxu1 %vm847_vm1, %v810_v11 }
 0x106   : > { %v813_v16 = vmax.f32 %v691_v13, 0.0  ;;  %2238 = vmatmul.mubr.msk.f32.gmra.mrb[6].mxu1 %vm847_vm1, %v811_v10 }
 0x107   : > { %v812_v17 = vmax.f32 %v686_v15, 0.0  ;;  %v2189_v18 = vpop.f32.mrb[10].mxu0 }
 0x108   : > { %v701_v19 = vadd.f32 %v2189_v18, %v2840_v44  ;;  %v695_v20 = vpop.f32.mrb[11].mxu0 }
 0x109   : > { %v696_v21 = vadd.f32 %v2840_v44, %v695_v20  ;;  %2240 = vmatprep.mubr.msk.f32.mxu1 %vm847_vm1, %v812_v17 }
 0x10a   : > { %v815_v22 = vmax.f32 %v701_v19, 0.0  ;;  %2241 = vmatmul.mubr.msk.f32.gmra.mrb[8].mxu1 %vm847_vm1, %v813_v16 }
 0x10b   : > { %v814_v23 = vmax.f32 %v696_v21, 0.0  ;;  %v2192_v24 = vpop.f32.mrb[12].mxu0  ;;  %v2909_v21 = vld [vmem:[%s3257_s5] ss:$0 sm:$0xff] }
 0x10c   : > { %v711_v25 = vadd.f32 %v2192_v24, %v2840_v44  ;;  %v705_v26 = vpop.f32.mrb[13].mxu0 }
 0x10d   : > { %v706_v27 = vadd.f32 %v2840_v44, %v705_v26  ;;  %2243 = vmatprep.mubr.msk.f32.mxu1 %vm847_vm1, %v814_v23 }
 0x10e   : > { %v817_v28 = vmax.f32 %v711_v25, 0.0  ;;  %2244 = vmatmul.mubr.msk.f32.gmra.mrb[10].mxu1 %vm847_vm1, %v815_v22  ;;  %v2916_v25 = vld [vmem:[%s3258_s6] ss:$0 sm:$0xff] }
 0x10f   : > { %v816_v29 = vmax.f32 %v706_v27, 0.0  ;;  %v2195_v30 = vpop.f32.mrb[14].mxu0 }
 0x110   : > { %v721_v31 = vadd.f32 %v2195_v30, %v2840_v44  ;;  %v715_v32 = vpop.f32.mrb[15].mxu0 }
 0x111   : > { %v716_v33 = vadd.f32 %v2840_v44, %v715_v32  ;;  %2246 = vmatprep.mubr.msk.f32.mxu1 %vm847_vm1, %v816_v29 }
 0x112   : > { %v819_v34 = vmax.f32 %v721_v31, 0.0  ;;  %2247 = vmatmul.mubr.msk.f32.gmra.mrb[12].mxu1 %vm847_vm1, %v817_v28 }
 0x113   : > { %v818_v35 = vmax.f32 %v716_v33, 0.0  ;;  %v2198_v36 = vpop.f32.mrb[16].mxu0 }
 0x114   : > { %v731_v37 = vadd.f32 %v2198_v36, %v2840_v44  ;;  %v725_v38 = vpop.f32.mrb[17].mxu0 }
 0x115   : > { %v726_v39 = vadd.f32 %v2840_v44, %v725_v38  ;;  %2249 = vmatprep.mubr.msk.f32.mxu1 %vm847_vm1, %v818_v35 }
 0x116   : > { %v821_v40 = vmax.f32 %v731_v37, 0.0  ;;  %2250 = vmatmul.mubr.msk.f32.gmra.mrb[14].mxu1 %vm847_vm1, %v819_v34 }
 0x117   : > { %v820_v41 = vmax.f32 %v726_v39, 0.0  ;;  %v2201_v42 = vpop.f32.mrb[18].mxu0 }
 0x118   : > { %v741_v43 = vadd.f32 %v2201_v42, %v2840_v44  ;;  %v735_v45 = vpop.f32.mrb[19].mxu0 }
 0x119   : > { %v736_v46 = vadd.f32 %v2840_v44, %v735_v45  ;;  %2252 = vmatprep.mubr.msk.f32.mxu1 %vm847_vm1, %v820_v41 }
 0x11a   : > { %v823_v47 = vmax.f32 %v741_v43, 0.0  ;;  %2253 = vmatmul.mubr.msk.f32.gmra.mrb[16].mxu1 %vm847_vm1, %v821_v40 }
 0x11b   : > { %v822_v48 = vmax.f32 %v736_v46, 0.0  ;;  %v2204_v49 = vpop.f32.mrb[20].mxu0 }
 0x11c   : > { %v751_v50 = vadd.f32 %v2204_v49, %v2840_v44  ;;  %v745_v52 = vpop.f32.mrb[21].mxu0 }
 0x11d   : > { %v746_v51 = vadd.f32 %v2840_v44, %v745_v52  ;;  %2255 = vmatprep.mubr.msk.f32.mxu1 %vm847_vm1, %v822_v48 }
 0x11e   : > { %v825_v53 = vmax.f32 %v751_v50, 0.0  ;;  %2256 = vmatmul.mubr.msk.f32.gmra.mrb[18].mxu1 %vm847_vm1, %v823_v47 }
 0x11f   : > { %v824_v54 = vmax.f32 %v746_v51, 0.0  ;;  %v2207_v55 = vpop.f32.mrb[22].mxu0 }
 0x120   : > { %v761_v56 = vadd.f32 %v2207_v55, %v2840_v44  ;;  %v755_v57 = vpop.f32.mrb[23].mxu0 }
 0x121   : > { %v756_v58 = vadd.f32 %v2840_v44, %v755_v57  ;;  %2258 = vmatprep.mubr.msk.f32.mxu1 %vm847_vm1, %v824_v54 }
 0x122   : > { %v827_v59 = vmax.f32 %v761_v56, 0.0  ;;  %2259 = vmatmul.mubr.msk.f32.gmra.mrb[20].mxu1 %vm847_vm1, %v825_v53 }
 0x123   : > { %v826_v60 = vmax.f32 %v756_v58, 0.0  ;;  %v2210_v61 = vpop.f32.mrb[24].mxu0 }
 0x124   : > { %v771_v62 = vadd.f32 %v2210_v61, %v2840_v44  ;;  %v765_v63 = vpop.f32.mrb[25].mxu0 }
 0x125   : > { %v766_v0 = vadd.f32 %v2840_v44, %v765_v63  ;;  %2261 = vmatprep.mubr.msk.f32.mxu1 %vm847_vm1, %v826_v60 }
 0x126   : > { %v829_v1 = vmax.f32 %v771_v62, 0.0  ;;  %2262 = vmatmul.mubr.msk.f32.gmra.mrb[22].mxu1 %vm847_vm1, %v827_v59 }
 0x127   : > { %v828_v2 = vmax.f32 %v766_v0, 0.0  ;;  %v2213_v3 = vpop.f32.mrb[26].mxu0 }
 0x128   : > { %v781_v4 = vadd.f32 %v2213_v3, %v2840_v44  ;;  %v775_v5 = vpop.f32.mrb[27].mxu0 }
 0x129   : > { %v776_v6 = vadd.f32 %v2840_v44, %v775_v5  ;;  %2264 = vmatprep.mubr.msk.f32.mxu1 %vm847_vm1, %v828_v2 }
 0x12a   : > { %v831_v7 = vmax.f32 %v781_v4, 0.0  ;;  %2265 = vmatmul.mubr.msk.f32.gmra.mrb[24].mxu1 %vm847_vm1, %v829_v1 }
 0x12b   : > { %v830_v8 = vmax.f32 %v776_v6, 0.0  ;;  %v2216_v9 = vpop.f32.mrb[28].mxu0 }
 0x12c   : > { %v791_v10 = vadd.f32 %v2216_v9, %v2840_v44  ;;  %v785_v11 = vpop.f32.mrb[29].mxu0 }
 0x12d   : > { %v786_v12 = vadd.f32 %v2840_v44, %v785_v11  ;;  %2267 = vmatprep.mubr.msk.f32.mxu1 %vm847_vm1, %v830_v8 }
 0x12e   : > { %v833_v13 = vmax.f32 %v791_v10, 0.0  ;;  %2268 = vmatmul.mubr.msk.f32.gmra.mrb[26].mxu1 %vm847_vm1, %v831_v7 }
 0x12f   : > { %v832_v14 = vmax.f32 %v786_v12, 0.0  ;;  %v2219_v15 = vpop.f32.mrb[30].mxu0 }
 0x130   : > { %v801_v16 = vadd.f32 %v2219_v15, %v2840_v44  ;;  %v795_v17 = vpop.f32.mrb[31].mxu0 }
 0x131   : > { %v796_v18 = vadd.f32 %v2840_v44, %v795_v17  ;;  %2270 = vmatprep.mubr.msk.f32.mxu1 %vm847_vm1, %v832_v14 }
 0x132   : > { %v835_v19 = vmax.f32 %v801_v16, 0.0  ;;  %2271 = vmatmul.mubr.msk.f32.gmra.mrb[28].mxu1 %vm847_vm1, %v833_v13 }
 0x133   : > { %v834_v20 = vmax.f32 %v796_v18, 0.0 }
 0x135   : > { %2273 = vmatprep.mubr.msk.f32.mxu1 %vm847_vm1, %v834_v20 }
 0x136   : > { %2274 = vmatmul.mubr.msk.f32.gmra.mrb[30].mxu1 %vm847_vm1, %v835_v19 }
 0x1cd   : > { %v2230_v22 = vpop.f32.mrb[0].mxu1 }
 0x1ce   : > { %v1016_v23 = vadd.f32 %v2230_v22, %v2909_v21  ;;  %v1010_v24 = vpop.f32.mrb[1].mxu1 }
 0x1cf   : > { %v1011_v44 = vadd.f32 %v2909_v21, %v1010_v24 }
 0x1d0   : > { %v1170_v26 = vmax.f32 %v1016_v23, 0.0 }
 0x1d1   : > { %v1169_v27 = vmax.f32 %v1011_v44, 0.0  ;;  %v2233_v28 = vpop.f32.mrb[2].mxu1 }
 0x1d2   : > { %v1026_v29 = vadd.f32 %v2233_v28, %v2909_v21  ;;  %v1020_v30 = vpop.f32.mrb[3].mxu1  ;;  %v1209_v31 = vmul.f32 %v2916_v25, %v1170_v26 }
 0x1d3   : > { %v1021_v32 = vadd.f32 %v2909_v21, %v1020_v30  ;;  %v1208_v35 = vmul.f32 %v2916_v25, %v1169_v27 }
 0x1d4   : > { %v1172_v33 = vmax.f32 %v1026_v29, 0.0  ;;  %v1243_v34 = vsel %vm847_vm1, %v1209_v31, 0.0 }
 0x1d5   : > { %v1171_v36 = vmax.f32 %v1021_v32, 0.0  ;;  %1244 = vadd.xlane.f32.xlu0 %v1243_v34  ;;  %v2236_v37 = vpop.f32.mrb[4].mxu1  ;;  %v1240_v45 = vsel %vm847_vm1, %v1208_v35, 0.0 }
 0x1d6   : > { %v1036_v38 = vadd.f32 %v2236_v37, %v2909_v21  ;;  %v1030_v39 = vpop.f32.mrb[5].mxu1  ;;  %v1211_v40 = vmul.f32 %v2916_v25, %v1172_v33 }
 0x1d7   : > { %v1031_v41 = vadd.f32 %v2909_v21, %v1030_v39  ;;  %v1210_v46 = vmul.f32 %v2916_v25, %v1171_v36 }
 0x1d8   : > { %v1174_v42 = vmax.f32 %v1036_v38, 0.0  ;;  %v1249_v43 = vsel %vm847_vm1, %v1211_v40, 0.0 }
 0x1d9   : > { %v1173_v47 = vmax.f32 %v1031_v41, 0.0  ;;  %1250 = vadd.xlane.f32.xlu1 %v1249_v43  ;;  %v2239_v48 = vpop.f32.mrb[6].mxu1  ;;  %1241 = vadd.xlane.f32.xlu0 %v1240_v45  ;;  %v1246_v54 = vsel %vm847_vm1, %v1210_v46, 0.0 }
 0x1da   : > { %v1046_v49 = vadd.f32 %v2239_v48, %v2909_v21  ;;  %v1040_v50 = vpop.f32.mrb[7].mxu1  ;;  %v1213_v55 = vmul.f32 %v2916_v25, %v1174_v42 }
 0x1db   : > { %v1041_v52 = vadd.f32 %v2909_v21, %v1040_v50  ;;  %v1212_v51 = vmul.f32 %v2916_v25, %v1173_v47 }
 0x1dc   : > { %v1176_v53 = vmax.f32 %v1046_v49, 0.0  ;;  %v1255_v0 = vsel %vm847_vm1, %v1213_v55, 0.0 }
 0x1dd   : > { %v1175_v56 = vmax.f32 %v1041_v52, 0.0  ;;  %v2242_v57 = vpop.f32.mrb[8].mxu1  ;;  %1247 = vadd.xlane.f32.xlu1 %v1246_v54  ;;  %v1252_v58 = vsel %vm847_vm1, %v1212_v51, 0.0 }
 0x1de   : > { %v1056_v59 = vadd.f32 %v2242_v57, %v2909_v21  ;;  %v1050_v60 = vpop.f32.mrb[9].mxu1  ;;  %1253 = vadd.xlane.f32.xlu0 %v1252_v58  ;;  %v1215_v1 = vmul.f32 %v2916_v25, %v1176_v53 }
 0x1df   : > { %v1051_v61 = vadd.f32 %v2909_v21, %v1050_v60  ;;  %v1214_v62 = vmul.f32 %v2916_v25, %v1175_v56 }
 0x1e0   : > { %v1178_v63 = vmax.f32 %v1056_v59, 0.0  ;;  %v1261_v10 = vsel %vm847_vm1, %v1215_v1, 0.0 }
 0x1e1   : > { %v1177_v2 = vmax.f32 %v1051_v61, 0.0  ;;  %v2245_v3 = vpop.f32.mrb[10].mxu1  ;;  %1256 = vadd.xlane.f32.xlu1 %v1255_v0  ;;  %v1258_v4 = vsel %vm847_vm1, %v1214_v62, 0.0 }
 0x1e2   : > { %v1066_v5 = vadd.f32 %v2245_v3, %v2909_v21  ;;  %v1060_v6 = vpop.f32.mrb[11].mxu1  ;;  %1259 = vadd.xlane.f32.xlu0 %v1258_v4  ;;  %v1217_v11 = vmul.f32 %v2916_v25, %v1178_v63 }
 0x1e3   : > { %v1061_v7 = vadd.f32 %v2909_v21, %v1060_v6  ;;  %v1216_v8 = vmul.f32 %v2916_v25, %v1177_v2 }
 0x1e4   : > { %v1180_v9 = vmax.f32 %v1066_v5, 0.0  ;;  %v1267_v20 = vsel %vm847_vm1, %v1217_v11, 0.0 }
 0x1e5   : > { %v1179_v12 = vmax.f32 %v1061_v7, 0.0  ;;  %v2248_v13 = vpop.f32.mrb[12].mxu1  ;;  %1262 = vadd.xlane.f32.xlu1 %v1261_v10  ;;  %v1264_v14 = vsel %vm847_vm1, %v1216_v8, 0.0 }
 0x1e6   : > { %v1076_v15 = vadd.f32 %v2248_v13, %v2909_v21  ;;  %v1070_v16 = vpop.f32.mrb[13].mxu1  ;;  %1265 = vadd.xlane.f32.xlu0 %v1264_v14  ;;  %v1219_v22 = vmul.f32 %v2916_v25, %v1180_v9 }
 0x1e7   : > { %v1071_v17 = vadd.f32 %v2909_v21, %v1070_v16  ;;  %v1218_v18 = vmul.f32 %v2916_v25, %v1179_v12 }
 0x1e8   : > { %v1182_v19 = vmax.f32 %v1076_v15, 0.0  ;;  %v1273_v31 = vsel %vm847_vm1, %v1219_v22, 0.0 }
 0x1e9   : > { %v1181_v23 = vmax.f32 %v1071_v17, 0.0  ;;  %v2251_v24 = vpop.f32.mrb[14].mxu1  ;;  %1268 = vadd.xlane.f32.xlu1 %v1267_v20  ;;  %v1270_v44 = vsel %vm847_vm1, %v1218_v18, 0.0 }
 0x1ea   : > { %v1086_v26 = vadd.f32 %v2251_v24, %v2909_v21  ;;  %v1080_v27 = vpop.f32.mrb[15].mxu1  ;;  %1271 = vadd.xlane.f32.xlu0 %v1270_v44  ;;  %v1221_v32 = vmul.f32 %v2916_v25, %v1182_v19 }
 0x1eb   : > { %v1081_v28 = vadd.f32 %v2909_v21, %v1080_v27  ;;  %v1220_v29 = vmul.f32 %v2916_v25, %v1181_v23 }
 0x1ec   : > { %v1184_v30 = vmax.f32 %v1086_v26, 0.0  ;;  %v1279_v41 = vsel %vm847_vm1, %v1221_v32, 0.0 }
 0x1ed   : > { %v1183_v33 = vmax.f32 %v1081_v28, 0.0  ;;  %v2254_v34 = vpop.f32.mrb[16].mxu1  ;;  %1274 = vadd.xlane.f32.xlu1 %v1273_v31  ;;  %v1276_v35 = vsel %vm847_vm1, %v1220_v29, 0.0 }
 0x1ee   : > { %v1096_v36 = vadd.f32 %v2254_v34, %v2909_v21  ;;  %v1090_v37 = vpop.f32.mrb[17].mxu1  ;;  %1277 = vadd.xlane.f32.xlu0 %v1276_v35  ;;  %v1223_v42 = vmul.f32 %v2916_v25, %v1184_v30 }
 0x1ef   : > { %v1091_v38 = vadd.f32 %v2909_v21, %v1090_v37  ;;  %v1222_v39 = vmul.f32 %v2916_v25, %v1183_v33 }
 0x1f0   : > { %v1186_v40 = vmax.f32 %v1096_v36, 0.0  ;;  %v1285_v51 = vsel %vm847_vm1, %v1223_v42, 0.0 }
 0x1f1   : > { %v1185_v43 = vmax.f32 %v1091_v38, 0.0  ;;  %v2257_v45 = vpop.f32.mrb[18].mxu1  ;;  %1280 = vadd.xlane.f32.xlu1 %v1279_v41  ;;  %v1282_v46 = vsel %vm847_vm1, %v1222_v39, 0.0 }
 0x1f2   : > { %v1106_v47 = vadd.f32 %v2257_v45, %v2909_v21  ;;  %v1100_v48 = vpop.f32.mrb[19].mxu1  ;;  %1283 = vadd.xlane.f32.xlu0 %v1282_v46  ;;  %v1225_v53 = vmul.f32 %v2916_v25, %v1186_v40 }
 0x1f3   : > { %v1101_v49 = vadd.f32 %v2909_v21, %v1100_v48  ;;  %v1224_v50 = vmul.f32 %v2916_v25, %v1185_v43 }
 0x1f4   : > { %v1188_v52 = vmax.f32 %v1106_v47, 0.0  ;;  %v1291_v62 = vsel %vm847_vm1, %v1225_v53, 0.0 }
 0x1f5   : > { %v1187_v54 = vmax.f32 %v1101_v49, 0.0  ;;  %v2260_v55 = vpop.f32.mrb[20].mxu1  ;;  %1286 = vadd.xlane.f32.xlu1 %v1285_v51  ;;  %v1288_v56 = vsel %vm847_vm1, %v1224_v50, 0.0 }
 0x1f6   : > { %v1116_v57 = vadd.f32 %v2260_v55, %v2909_v21  ;;  %v1110_v58 = vpop.f32.mrb[21].mxu1  ;;  %1289 = vadd.xlane.f32.xlu0 %v1288_v56  ;;  %v1227_v63 = vmul.f32 %v2916_v25, %v1188_v52 }
 0x1f7   : > { %v1111_v59 = vadd.f32 %v2909_v21, %v1110_v58  ;;  %v1226_v60 = vmul.f32 %v2916_v25, %v1187_v54  ;;  %v3012_v58 = vld [vmem:[#allocation2] ss:$0 sm:$0xff] }
 0x1f8   : > { %v1190_v61 = vmax.f32 %v1116_v57, 0.0  ;;  %v1297_v8 = vsel %vm847_vm1, %v1227_v63, 0.0 }
 0x1f9   : > { %v1189_v0 = vmax.f32 %v1111_v59, 0.0  ;;  %v2263_v1 = vpop.f32.mrb[22].mxu1  ;;  %1292 = vadd.xlane.f32.xlu1 %v1291_v62  ;;  %v1294_v2 = vsel %vm847_vm1, %v1226_v60, 0.0 }
 0x1fa   : > { %v1126_v3 = vadd.f32 %v2263_v1, %v2909_v21  ;;  %v1120_v4 = vpop.f32.mrb[23].mxu1  ;;  %1295 = vadd.xlane.f32.xlu0 %v1294_v2  ;;  %v1229_v9 = vmul.f32 %v2916_v25, %v1190_v61 }
 0x1fb   : > { %v1121_v5 = vadd.f32 %v2909_v21, %v1120_v4  ;;  %v1228_v6 = vmul.f32 %v2916_v25, %v1189_v0 }
 0x1fc   : > { %v1192_v7 = vmax.f32 %v1126_v3, 0.0  ;;  %v1303_v18 = vsel %vm847_vm1, %v1229_v9, 0.0 }
 0x1fd   : > { %v1191_v10 = vmax.f32 %v1121_v5, 0.0  ;;  %v2266_v11 = vpop.f32.mrb[24].mxu1  ;;  %1298 = vadd.xlane.f32.xlu1 %v1297_v8  ;;  %v1300_v12 = vsel %vm847_vm1, %v1228_v6, 0.0 }
 0x1fe   : > { %v1136_v13 = vadd.f32 %v2266_v11, %v2909_v21  ;;  %v1130_v14 = vpop.f32.mrb[25].mxu1  ;;  %1301 = vadd.xlane.f32.xlu0 %v1300_v12  ;;  %v1231_v19 = vmul.f32 %v2916_v25, %v1192_v7 }
 0x1ff   : > { %v1131_v15 = vadd.f32 %v2909_v21, %v1130_v14  ;;  %v1230_v16 = vmul.f32 %v2916_v25, %v1191_v10 }
 0x200   : > { %v1194_v17 = vmax.f32 %v1136_v13, 0.0  ;;  %v1309_v29 = vsel %vm847_vm1, %v1231_v19, 0.0 }
 0x201   : > { %v1193_v20 = vmax.f32 %v1131_v15, 0.0  ;;  %v2269_v22 = vpop.f32.mrb[26].mxu1  ;;  %1304 = vadd.xlane.f32.xlu1 %v1303_v18  ;;  %v1306_v23 = vsel %vm847_vm1, %v1230_v16, 0.0 }
 0x202   : > { %v1146_v24 = vadd.f32 %v2269_v22, %v2909_v21  ;;  %v1140_v44 = vpop.f32.mrb[27].mxu1  ;;  %1307 = vadd.xlane.f32.xlu0 %v1306_v23  ;;  %v1233_v30 = vmul.f32 %v2916_v25, %v1194_v17 }
 0x203   : > { %v1141_v26 = vadd.f32 %v2909_v21, %v1140_v44  ;;  %v1232_v27 = vmul.f32 %v2916_v25, %v1193_v20 }
 0x204   : > { %v1196_v28 = vmax.f32 %v1146_v24, 0.0  ;;  %v1315_v39 = vsel %vm847_vm1, %v1233_v30, 0.0 }
 0x205   : > { %v1195_v31 = vmax.f32 %v1141_v26, 0.0  ;;  %v2272_v32 = vpop.f32.mrb[28].mxu1  ;;  %1310 = vadd.xlane.f32.xlu1 %v1309_v29  ;;  %v1312_v33 = vsel %vm847_vm1, %v1232_v27, 0.0 }
 0x206   : > { %v1156_v34 = vadd.f32 %v2272_v32, %v2909_v21  ;;  %v1150_v35 = vpop.f32.mrb[29].mxu1  ;;  %1313 = vadd.xlane.f32.xlu0 %v1312_v33  ;;  %v1235_v40 = vmul.f32 %v2916_v25, %v1196_v28 }
 0x207   : > { %v1151_v36 = vadd.f32 %v2909_v21, %v1150_v35  ;;  %v1234_v37 = vmul.f32 %v2916_v25, %v1195_v31 }
 0x208   : > { %v1198_v38 = vmax.f32 %v1156_v34, 0.0  ;;  %v1321_v50 = vsel %vm847_vm1, %v1235_v40, 0.0 }
 0x209   : > { %v1197_v41 = vmax.f32 %v1151_v36, 0.0  ;;  %v2275_v42 = vpop.f32.mrb[30].mxu1  ;;  %1316 = vadd.xlane.f32.xlu1 %v1315_v39  ;;  %v1318_v43 = vsel %vm847_vm1, %v1234_v37, 0.0 }
 0x20a   : > { %v1166_v45 = vadd.f32 %v2275_v42, %v2909_v21  ;;  %v1160_v46 = vpop.f32.mrb[31].mxu1  ;;  %1319 = vadd.xlane.f32.xlu0 %v1318_v43  ;;  %v1237_v52 = vmul.f32 %v2916_v25, %v1198_v38 }
 0x20b   : > { %v1161_v47 = vadd.f32 %v2909_v21, %v1160_v46  ;;  %v1236_v48 = vmul.f32 %v2916_v25, %v1197_v41 }
 0x20c   : > { %v1200_v49 = vmax.f32 %v1166_v45, 0.0  ;;  %v1327_v56 = vsel %vm847_vm1, %v1237_v52, 0.0 }
 0x20d   : > { %v1199_v51 = vmax.f32 %v1161_v47, 0.0  ;;  %1322 = vadd.xlane.f32.xlu1 %v1321_v50  ;;  %v1324_v53 = vsel %vm847_vm1, %v1236_v48, 0.0 }
 0x20e   : > { %1325 = vadd.xlane.f32.xlu0 %v1324_v53  ;;  %v1239_v54 = vmul.f32 %v2916_v25, %v1200_v49 }
 0x20f   : > { %v1238_v55 = vmul.f32 %v2916_v25, %v1199_v51 }
 0x210   : > { %v1333_v57 = vsel %vm847_vm1, %v1239_v54, 0.0 }
 0x211   : > { %1328 = vadd.xlane.f32.xlu1 %v1327_v56  ;;  %v1330_v21 = vsel %vm847_vm1, %v1238_v55, 0.0 }
 0x212   : > { %1331 = vadd.xlane.f32.xlu0 %v1330_v21 }
 0x215   : > { %1334 = vadd.xlane.f32.xlu1 %v1333_v57 }
 0x262   : > { %v1245_v59 = vpop.xlane.xlu0 %1244 }
 0x263   : > { %v1344_v60 = vadd.f32 %v3012_v58, %v1245_v59 }
 0x265   : > { %v2029_v61 = vmul.f32 -1.442695, %v1344_v60 }
 0x266   : > { %v1251_v62 = vpop.xlane.xlu1 %1250  ;;  %v1242_v63 = vpop.xlane.xlu0 %1241 }
 0x267   : > { %2388 = vpow2.f32 %v2029_v61  ;;  %v1346_v25 = vadd.f32 %v3012_v58, %v1251_v62  ;;  %v1343_v0 = vadd.f32 %v3012_v58, %v1242_v63 }
 0x269   : > { %v2031_v1 = vmul.f32 -1.442695, %v1346_v25  ;;  %v2028_v2 = vmul.f32 -1.442695, %v1343_v0 }
 0x26a   : > { %v1248_v3 = vpop.xlane.xlu1 %1247 }
 0x26b   : > { %2390 = vpow2.f32 %v2031_v1  ;;  %v1345_v4 = vadd.f32 %v3012_v58, %v1248_v3  ;;  %v1254_v5 = vpop.xlane.xlu0 %1253 }
 0x26c   : > { %2392 = vpow2.f32 %v2028_v2  ;;  %v1347_v6 = vadd.f32 %v3012_v58, %v1254_v5 }
 0x26d   : > { %v2030_v7 = vmul.f32 -1.442695, %v1345_v4 }
 0x26e   : > { %v2032_v8 = vmul.f32 -1.442695, %v1347_v6  ;;  %v1257_v9 = vpop.xlane.xlu1 %1256 }
 0x26f   : > { %2394 = vpow2.f32 %v2030_v7  ;;  %v1348_v10 = vadd.f32 %v3012_v58, %v1257_v9  ;;  %v1260_v11 = vpop.xlane.xlu0 %1259 }
 0x270   : > { %2396 = vpow2.f32 %v2032_v8  ;;  %v1349_v12 = vadd.f32 %v3012_v58, %v1260_v11 }
 0x271   : > { %v2389_v13 = vpop.eup %2388  ;;  %v2033_v14 = vmul.f32 -1.442695, %v1348_v10 }
 0x272   : > { %v1472_v15 = vadd.f32 1.0, %v2389_v13  ;;  %v2034_v16 = vmul.f32 -1.442695, %v1349_v12  ;;  %v1263_v17 = vpop.xlane.xlu1 %1262 }
 0x273   : > { %2398 = vpow2.f32 %v2033_v14  ;;  %v1350_v18 = vadd.f32 %v3012_v58, %v1263_v17  ;;  %v1266_v19 = vpop.xlane.xlu0 %1265 }
 0x274   : > { %2400 = vrcp.f32 %v1472_v15  ;;  %v1351_v20 = vadd.f32 %v3012_v58, %v1266_v19 }
 0x275   : > { %v2391_v22 = vpop.eup %2390  ;;  %2402 = vpow2.f32 %v2034_v16  ;;  %v2035_v23 = vmul.f32 -1.442695, %v1350_v18 }
 0x276   : > { %v2393_v24 = vpop.eup %2392  ;;  %v1474_v44 = vadd.f32 1.0, %v2391_v22  ;;  %v2036_v26 = vmul.f32 -1.442695, %v1351_v20  ;;  %v1269_v27 = vpop.xlane.xlu1 %1268 }
 0x277   : > { %v1471_v28 = vadd.f32 1.0, %v2393_v24  ;;  %2404 = vpow2.f32 %v2035_v23  ;;  %v1352_v29 = vadd.f32 %v3012_v58, %v1269_v27  ;;  %v1272_v30 = vpop.xlane.xlu0 %1271 }
 0x278   : > { %2406 = vrcp.f32 %v1474_v44  ;;  %v1353_v31 = vadd.f32 %v3012_v58, %v1272_v30 }
 0x279   : > { %v2395_v32 = vpop.eup %2394  ;;  %2408 = vrcp.f32 %v1471_v28  ;;  %v2037_v33 = vmul.f32 -1.442695, %v1352_v29 }
 0x27a   : > { %v2397_v34 = vpop.eup %2396  ;;  %v1473_v35 = vadd.f32 1.0, %v2395_v32  ;;  %2410 = vpow2.f32 %v2036_v26  ;;  %v2038_v36 = vmul.f32 -1.442695, %v1353_v31  ;;  %v1275_v37 = vpop.xlane.xlu1 %1274 }
 0x27b   : > { %v1475_v38 = vadd.f32 1.0, %v2397_v34  ;;  %2412 = vpow2.f32 %v2037_v33  ;;  %v1354_v39 = vadd.f32 %v3012_v58, %v1275_v37  ;;  %v1278_v40 = vpop.xlane.xlu0 %1277 }
 0x27c   : > { %2414 = vrcp.f32 %v1473_v35  ;;  %v1355_v41 = vadd.f32 %v3012_v58, %v1278_v40 }
 0x27d   : > { %v2399_v42 = vpop.eup %2398  ;;  %2416 = vrcp.f32 %v1475_v38  ;;  %v2039_v43 = vmul.f32 -1.442695, %v1354_v39 }
 0x27e   : > { %v2401_v45 = vpop.eup %2400  ;;  %v1476_v46 = vadd.f32 1.0, %v2399_v42  ;;  %2418 = vpow2.f32 %v2038_v36  ;;  %v2040_v47 = vmul.f32 -1.442695, %v1355_v41  ;;  %v1281_v48 = vpop.xlane.xlu1 %1280 }
 0x27f   : > { %v2403_v49 = vpop.eup %2402  ;;  %1569 = vst.msk [vmem:[%s3028_s29 + $0x8] sm:$0xff] %vm1567_vm2, %v2401_v45  ;;  %2420 = vpow2.f32 %v2039_v43  ;;  %v1356_v50 = vadd.f32 %v3012_v58, %v1281_v48  ;;  %v1284_v52 = vpop.xlane.xlu0 %1283 }
 0x280   : > { %2422 = vrcp.f32 %v1476_v46  ;;  %v1477_v51 = vadd.f32 1.0, %v2403_v49  ;;  %v1357_v53 = vadd.f32 %v3012_v58, %v1284_v52 }
 0x281   : > { %v2405_v54 = vpop.eup %2404  ;;  %2424 = vpow2.f32 %v2040_v47  ;;  %v2041_v55 = vmul.f32 -1.442695, %v1356_v50 }
 0x282   : > { %v2407_v56 = vpop.eup %2406  ;;  %2426 = vrcp.f32 %v1477_v51  ;;  %v1478_v21 = vadd.f32 1.0, %v2405_v54  ;;  %v2042_v57 = vmul.f32 -1.442695, %v1357_v53  ;;  %v1287_v59 = vpop.xlane.xlu1 %1286 }
 0x283   : > { %v2409_v60 = vpop.eup %2408  ;;  %1571 = vst.msk [vmem:[%s3028_s29 + $0x18] sm:$0xff] %vm1567_vm2, %v2407_v56  ;;  %2428 = vpow2.f32 %v2041_v55  ;;  %v1358_v61 = vadd.f32 %v3012_v58, %v1287_v59  ;;  %v1290_v62 = vpop.xlane.xlu0 %1289 }
 0x284   : > { %v2411_v63 = vpop.eup %2410  ;;  %1568 = vst.msk [vmem:[%s3028_s29] sm:$0xff] %vm1567_vm2, %v2409_v60  ;;  %2430 = vrcp.f32 %v1478_v21  ;;  %v1359_v25 = vadd.f32 %v3012_v58, %v1290_v62 }
 0x285   : > { %v2413_v0 = vpop.eup %2412  ;;  %v1479_v1 = vadd.f32 1.0, %v2411_v63  ;;  %2432 = vpow2.f32 %v2042_v57  ;;  %v2043_v2 = vmul.f32 -1.442695, %v1358_v61 }
 0x286   : > { %v2415_v3 = vpop.eup %2414  ;;  %v1480_v4 = vadd.f32 1.0, %v2413_v0  ;;  %v2044_v5 = vmul.f32 -1.442695, %v1359_v25  ;;  %v1293_v6 = vpop.xlane.xlu1 %1292 }
 0x287   : > { %v2417_v7 = vpop.eup %2416  ;;  %1570 = vst.msk [vmem:[%s3028_s29 + $0x10] sm:$0xff] %vm1567_vm2, %v2415_v3  ;;  %2434 = vrcp.f32 %v1479_v1  ;;  %v1360_v8 = vadd.f32 %v3012_v58, %v1293_v6  ;;  %v1296_v9 = vpop.xlane.xlu0 %1295 }
 0x288   : > { %v2419_v10 = vpop.eup %2418  ;;  %1572 = vst.msk [vmem:[%s3028_s29 + $0x20] sm:$0xff] %vm1567_vm2, %v2417_v7  ;;  %2436 = vrcp.f32 %v1480_v4  ;;  %v1361_v11 = vadd.f32 %v3012_v58, %v1296_v9 }
 0x289   : > { %v2421_v12 = vpop.eup %2420  ;;  %v1481_v13 = vadd.f32 1.0, %v2419_v10  ;;  %2438 = vpow2.f32 %v2043_v2  ;;  %v2045_v14 = vmul.f32 -1.442695, %v1360_v8 }
 0x28a   : > { %v2423_v15 = vpop.eup %2422  ;;  %v1482_v16 = vadd.f32 1.0, %v2421_v12  ;;  %2440 = vpow2.f32 %v2044_v5  ;;  %v1299_v17 = vpop.xlane.xlu1 %1298  ;;  %v2046_v19 = vmul.f32 -1.442695, %v1361_v11 }
 0x28b   : > { %v2425_v18 = vpop.eup %2424  ;;  %1573 = vst.msk [vmem:[%s3028_s29 + $0x28] sm:$0xff] %vm1567_vm2, %v2423_v15  ;;  %2442 = vrcp.f32 %v1481_v13  ;;  %v1362_v20 = vadd.f32 %v3012_v58, %v1299_v17  ;;  %v1302_v22 = vpop.xlane.xlu0 %1301 }
 0x28c   : > { %v2427_v23 = vpop.eup %2426  ;;  %2444 = vrcp.f32 %v1482_v16  ;;  %v1483_v24 = vadd.f32 1.0, %v2425_v18  ;;  %v1363_v44 = vadd.f32 %v3012_v58, %v1302_v22 }
 0x28d   : > { %v2429_v26 = vpop.eup %2428  ;;  %1574 = vst.msk [vmem:[%s3028_s29 + $0x30] sm:$0xff] %vm1567_vm2, %v2427_v23  ;;  %2446 = vpow2.f32 %v2045_v14  ;;  %v2047_v27 = vmul.f32 -1.442695, %v1362_v20 }
 0x28e   : > { %v2431_v28 = vpop.eup %2430  ;;  %2448 = vrcp.f32 %v1483_v24  ;;  %v1484_v29 = vadd.f32 1.0, %v2429_v26  ;;  %v1305_v30 = vpop.xlane.xlu1 %1304  ;;  %v2048_v32 = vmul.f32 -1.442695, %v1363_v44 }
 0x28f   : > { %v2433_v31 = vpop.eup %2432  ;;  %1575 = vst.msk [vmem:[%s3028_s29 + $0x38] sm:$0xff] %vm1567_vm2, %v2431_v28  ;;  %2450 = vpow2.f32 %v2046_v19  ;;  %v1364_v33 = vadd.f32 %v3012_v58, %v1305_v30  ;;  %v1308_v34 = vpop.xlane.xlu0 %1307 }
 0x290   : > { %2452 = vrcp.f32 %v1484_v29  ;;  %v1485_v35 = vadd.f32 1.0, %v2433_v31  ;;  %v1365_v36 = vadd.f32 %v3012_v58, %v1308_v34 }
 0x291   : > { %v2435_v37 = vpop.eup %2434  ;;  %2454 = vpow2.f32 %v2047_v27  ;;  %v2049_v38 = vmul.f32 -1.442695, %v1364_v33 }
 0x292   : > { %v2437_v39 = vpop.eup %2436  ;;  %1576 = vst.msk [vmem:[%s3028_s29 + $0x40] sm:$0xff] %vm1567_vm2, %v2435_v37  ;;  %2456 = vrcp.f32 %v1485_v35  ;;  %v2050_v40 = vmul.f32 -1.442695, %v1365_v36  ;;  %v1311_v41 = vpop.xlane.xlu1 %1310 }
 0x293   : > { %v2439_v42 = vpop.eup %2438  ;;  %1577 = vst.msk [vmem:[%s3028_s29 + $0x48] sm:$0xff] %vm1567_vm2, %v2437_v39  ;;  %2458 = vpow2.f32 %v2048_v32  ;;  %v1366_v43 = vadd.f32 %v3012_v58, %v1311_v41  ;;  %v1314_v45 = vpop.xlane.xlu0 %1313 }
 0x294   : > { %v2441_v46 = vpop.eup %2440  ;;  %v1486_v47 = vadd.f32 1.0, %v2439_v42  ;;  %2460 = vpow2.f32 %v2049_v38  ;;  %v1367_v48 = vadd.f32 %v3012_v58, %v1314_v45 }
 0x295   : > { %v2443_v49 = vpop.eup %2442  ;;  %v1487_v50 = vadd.f32 1.0, %v2441_v46  ;;  %2462 = vpow2.f32 %v2050_v40  ;;  %v2051_v52 = vmul.f32 -1.442695, %v1366_v43 }
 0x296   : > { %v2445_v51 = vpop.eup %2444  ;;  %1578 = vst.msk [vmem:[%s3028_s29 + $0x50] sm:$0xff] %vm1567_vm2, %v2443_v49  ;;  %2464 = vrcp.f32 %v1486_v47  ;;  %v2052_v53 = vmul.f32 -1.442695, %v1367_v48  ;;  %v1317_v54 = vpop.xlane.xlu1 %1316 }
 0x297   : > { %v2447_v55 = vpop.eup %2446  ;;  %1579 = vst.msk [vmem:[%s3028_s29 + $0x58] sm:$0xff] %vm1567_vm2, %v2445_v51  ;;  %2466 = vrcp.f32 %v1487_v50  ;;  %v1368_v56 = vadd.f32 %v3012_v58, %v1317_v54  ;;  %v1320_v21 = vpop.xlane.xlu0 %1319 }
 0x298   : > { %v2449_v57 = vpop.eup %2448  ;;  %v1488_v59 = vadd.f32 1.0, %v2447_v55  ;;  %2468 = vpow2.f32 %v2051_v52  ;;  %v1369_v60 = vadd.f32 %v3012_v58, %v1320_v21 }
 0x299   : > { %v2451_v61 = vpop.eup %2450  ;;  %1580 = vst.msk [vmem:[%s3028_s29 + $0x60] sm:$0xff] %vm1567_vm2, %v2449_v57  ;;  %2470 = vpow2.f32 %v2052_v53  ;;  %v2053_v62 = vmul.f32 -1.442695, %v1368_v56 }
 0x29a   : > { %v2453_v63 = vpop.eup %2452  ;;  %2472 = vrcp.f32 %v1488_v59  ;;  %v1489_v25 = vadd.f32 1.0, %v2451_v61  ;;  %v2054_v0 = vmul.f32 -1.442695, %v1369_v60  ;;  %v1323_v1 = vpop.xlane.xlu1 %1322 }
 0x29b   : > { %v2455_v2 = vpop.eup %2454  ;;  %1581 = vst.msk [vmem:[%s3028_s29 + $0x68] sm:$0xff] %vm1567_vm2, %v2453_v63  ;;  %2474 = vpow2.f32 %v2053_v62  ;;  %v1370_v3 = vadd.f32 %v3012_v58, %v1323_v1  ;;  %v1326_v4 = vpop.xlane.xlu0 %1325 }
 0x29c   : > { %v2457_v5 = vpop.eup %2456  ;;  %2476 = vrcp.f32 %v1489_v25  ;;  %v1490_v6 = vadd.f32 1.0, %v2455_v2  ;;  %v1371_v7 = vadd.f32 %v3012_v58, %v1326_v4 }
 0x29d   : > { %v2459_v8 = vpop.eup %2458  ;;  %1582 = vst.msk [vmem:[%s3028_s29 + $0x70] sm:$0xff] %vm1567_vm2, %v2457_v5  ;;  %2478 = vpow2.f32 %v2054_v0  ;;  %v2055_v9 = vmul.f32 -1.442695, %v1370_v3 }
 0x29e   : > { %v2461_v10 = vpop.eup %2460  ;;  %2480 = vrcp.f32 %v1490_v6  ;;  %v1491_v11 = vadd.f32 1.0, %v2459_v8  ;;  %v1329_v12 = vpop.xlane.xlu1 %1328  ;;  %v2056_v15 = vmul.f32 -1.442695, %v1371_v7 }
 0x29f   : > { %v2463_v13 = vpop.eup %2462  ;;  %v1492_v14 = vadd.f32 1.0, %v2461_v10  ;;  %2482 = vpow2.f32 %v2055_v9  ;;  %v1372_v16 = vadd.f32 %v3012_v58, %v1329_v12  ;;  %v1332_v17 = vpop.xlane.xlu0 %1331 }
 0x2a0   : > { %v2465_v18 = vpop.eup %2464  ;;  %2484 = vrcp.f32 %v1491_v11  ;;  %v1493_v19 = vadd.f32 1.0, %v2463_v13  ;;  %v1373_v20 = vadd.f32 %v3012_v58, %v1332_v17 }
 0x2a1   : > { %v2467_v22 = vpop.eup %2466  ;;  %1583 = vst.msk [vmem:[%s3028_s29 + $0x78] sm:$0xff] %vm1567_vm2, %v2465_v18  ;;  %2486 = vrcp.f32 %v1492_v14  ;;  %v2057_v23 = vmul.f32 -1.442695, %v1372_v16 }
 0x2a2   : > { %v2469_v24 = vpop.eup %2468  ;;  %1584 = vst.msk [vmem:[%s3028_s29 + $0x80] sm:$0xff] %vm1567_vm2, %v2467_v22  ;;  %2488 = vrcp.f32 %v1493_v19  ;;  %v1335_v44 = vpop.xlane.xlu1 %1334  ;;  %v2058_v28 = vmul.f32 -1.442695, %v1373_v20 }
 0x2a3   : > { %v2471_v26 = vpop.eup %2470  ;;  %v1494_v27 = vadd.f32 1.0, %v2469_v24  ;;  %2490 = vpow2.f32 %v2056_v15  ;;  %v1374_v29 = vadd.f32 %v3012_v58, %v1335_v44 }
 0x2a4   : > { %v2473_v30 = vpop.eup %2472  ;;  %v1495_v31 = vadd.f32 1.0, %v2471_v26  ;;  %2492 = vpow2.f32 %v2057_v23 }
 0x2a5   : > { %v2475_v32 = vpop.eup %2474  ;;  %1585 = vst.msk [vmem:[%s3028_s29 + $0x88] sm:$0xff] %vm1567_vm2, %v2473_v30  ;;  %2494 = vrcp.f32 %v1494_v27  ;;  %v2059_v33 = vmul.f32 -1.442695, %v1374_v29 }
 0x2a6   : > { %v2477_v34 = vpop.eup %2476  ;;  %2496 = vrcp.f32 %v1495_v31  ;;  %v1496_v35 = vadd.f32 1.0, %v2475_v32 }
 0x2a7   : > { %v2479_v36 = vpop.eup %2478  ;;  %1586 = vst.msk [vmem:[%s3028_s29 + $0x90] sm:$0xff] %vm1567_vm2, %v2477_v34  ;;  %2498 = vpow2.f32 %v2058_v28 }
 0x2a8   : > { %v2481_v58 = vpop.eup %2480  ;;  %2500 = vrcp.f32 %v1496_v35  ;;  %v1497_v37 = vadd.f32 1.0, %v2479_v36 }
 0x2a9   : > { %v2483_v38 = vpop.eup %2482  ;;  %1587 = vst.msk [vmem:[%s3028_s29 + $0x98] sm:$0xff] %vm1567_vm2, %v2481_v58  ;;  %2502 = vpow2.f32 %v2059_v33 }
 0x2aa   : > { %v2485_v39 = vpop.eup %2484  ;;  %2504 = vrcp.f32 %v1497_v37  ;;  %v1498_v40 = vadd.f32 1.0, %v2483_v38 }
 0x2ab   : > { %v2487_v41 = vpop.eup %2486  ;;  %1588 = vst.msk [vmem:[%s3028_s29 + $0xa0] sm:$0xff] %vm1567_vm2, %v2485_v39 }
 0x2ac   : > { %v2489_v42 = vpop.eup %2488  ;;  %1589 = vst.msk [vmem:[%s3028_s29 + $0xa8] sm:$0xff] %vm1567_vm2, %v2487_v41  ;;  %2506 = vrcp.f32 %v1498_v40 }
 0x2ad   : > { %v2491_v43 = vpop.eup %2490  ;;  %1590 = vst.msk [vmem:[%s3028_s29 + $0xb0] sm:$0xff] %vm1567_vm2, %v2489_v42 }
 0x2ae   : > { %v2493_v45 = vpop.eup %2492  ;;  %v1499_v46 = vadd.f32 1.0, %v2491_v43 }
 0x2af   : > { %v2495_v47 = vpop.eup %2494  ;;  %v1500_v48 = vadd.f32 1.0, %v2493_v45 }
 0x2b0   : > { %v2497_v49 = vpop.eup %2496  ;;  %1591 = vst.msk [vmem:[%s3028_s29 + $0xb8] sm:$0xff] %vm1567_vm2, %v2495_v47  ;;  %2508 = vrcp.f32 %v1499_v46 }
 0x2b1   : > { %v2499_v50 = vpop.eup %2498  ;;  %1592 = vst.msk [vmem:[%s3028_s29 + $0xc0] sm:$0xff] %vm1567_vm2, %v2497_v49  ;;  %2510 = vrcp.f32 %v1500_v48 }
 0x2b2   : > { %v2501_v52 = vpop.eup %2500  ;;  %v1501_v51 = vadd.f32 1.0, %v2499_v50 }
 0x2b3   : > { %v2503_v53 = vpop.eup %2502  ;;  %1593 = vst.msk [vmem:[%s3028_s29 + $0xc8] sm:$0xff] %vm1567_vm2, %v2501_v52 }
 0x2b4   : > { %v2505_v54 = vpop.eup %2504  ;;  %2512 = vrcp.f32 %v1501_v51  ;;  %v1502_v55 = vadd.f32 1.0, %v2503_v53 }
 0x2b5   : > { %1594 = vst.msk [vmem:[%s3028_s29 + $0xd0] sm:$0xff] %vm1567_vm2, %v2505_v54 }
 0x2b6   : > { %v2507_v56 = vpop.eup %2506  ;;  %2514 = vrcp.f32 %v1502_v55 }
 0x2b7   : > { %1595 = vst.msk [vmem:[%s3028_s29 + $0xd8] sm:$0xff] %vm1567_vm2, %v2507_v56 }
 0x2ba   : > { %v2509_v21 = vpop.eup %2508 }
 0x2bb   : > { %v2511_v57 = vpop.eup %2510  ;;  %1596 = vst.msk [vmem:[%s3028_s29 + $0xe0] sm:$0xff] %vm1567_vm2, %v2509_v21  ;;  %1606 = sbr.rel (!%p2677_p4) target bundleno = 762 (0x2fa), region = 56 }
 0x2bc   : > { %1597 = vst.msk [vmem:[%s3028_s29 + $0xe8] sm:$0xff] %vm1567_vm2, %v2511_v57 }
 0x2be   : > { %v2513_v59 = vpop.eup %2512 }
 0x2bf   : > { %1598 = vst.msk [vmem:[%s3028_s29 + $0xf0] sm:$0xff] %vm1567_vm2, %v2513_v59 }
 0x2c0   : > { %v2515_v60 = vpop.eup %2514 }
 0x2c1   : > { %1599 = vst.msk [vmem:[%s3028_s29 + $0xf8] sm:$0xff] %vm1567_vm2, %v2515_v60 }
 0x2c2   : > { %s3271_s24 = smov (!%p1609_p8, %s1608_s24), 32 }
 0x2c3   : > { %s2062_s9 = sshll.u32 %s3271_s24, 7 }
 0x2c4   : > { %p2065_p9 = scmp.eq.s32.totalorder %s2062_s9, 0 }
 0x2c5   : > { %s3126_s11 = sshrl.u32 (!%p2065_p9), %s3271_s24, 5 }
 0x2c6   : > { %1617 = sbr.rel (%p2065_p9) target bundleno = 762 (0x2fa), region = 60  ;;  %p2066_p10 = scmp.le.s32.totalorder (!%p2065_p9), %s3126_s11, 0 }
 0x2cd   : > { %1901 = sbr.rel (%p2066_p10) target bundleno = 741 (0x2e5), region = 139  ;;  %s3262_s7 = smov (!%p2066_p10), %s3120_s28 }
 0x2ce   : > { %s3263_s14 = smov (!%p2066_p10), %s3028_s29  ;;  %s3135_s21 = smov (!%p2066_p10), 0  }
 0x2cf   : > { %s3137_s12 = smov (!%p2066_p10), 0  }
 0x2d4 LB: >> { %v1741_v61 = vld [vmem:[%s2578_s14] sm:$0xff]  ;;  %v1743_v62 = vld [vmem:[%s2578_s14 + $0x8] sm:$0xff]  ;;  %v1745_v63 = vld [vmem:[%s2578_s14 + $0x10] sm:$0xff]  ;;  %s1805_s15 = sadd.s32 1, %s2582_s21  ;;  %s1735_s12 = sadd.s32 1, %s2586_s12   ;;  %s2586_s12 = sphi %s3137_s12, %s1735_s12   ;;  %s2582_s21 = sphi %s3135_s21, %s3266_s21   ;;  %s2578_s14 = sphi %s3263_s14, %s3265_s14   ;;  %s2574_s7 = sphi %s3262_s7, %s3264_s7  }
 0x2d5   : >> { %1742 = vst [vmem:[%s2574_s7] sm:$0xff] %v1741_v61  ;;  %1744 = vst [vmem:[%s2574_s7 + $0x8] sm:$0xff] %v1743_v62  ;;  %v1747_v25 = vld [vmem:[%s2578_s14 + $0x18] sm:$0xff]  ;;  %v1749_v0 = vld [vmem:[%s2578_s14 + $0x20] sm:$0xff]  ;;  %p1806_p11 = scmp.ge.s32.totalorder %s1805_s15, %s3126_s11  ;;  %p1734_p12 = scmp.ge.s32.totalorder %s1735_s12, %s3126_s11 }
 0x2d6   : >> { %1746 = vst [vmem:[%s2574_s7 + $0x10] sm:$0xff] %v1745_v63  ;;  %v1751_v1 = vld [vmem:[%s2578_s14 + $0x28] sm:$0xff]  ;;  %1748 = vst [vmem:[%s2574_s7 + $0x18] sm:$0xff] %v1747_v25  ;;  %v1753_v2 = vld [vmem:[%s2578_s14 + $0x30] sm:$0xff] }
 0x2d7   : >> { %1750 = vst [vmem:[%s2574_s7 + $0x20] sm:$0xff] %v1749_v0  ;;  %1752 = vst [vmem:[%s2574_s7 + $0x28] sm:$0xff] %v1751_v1  ;;  %v1755_v3 = vld [vmem:[%s2578_s14 + $0x38] sm:$0xff]  ;;  %v1757_v4 = vld [vmem:[%s2578_s14 + $0x40] sm:$0xff]  ;;  %s3273_s15 = smov (%p1806_p11, %s1805_s15), 0 }
 0x2d8   : >> { %1754 = vst [vmem:[%s2574_s7 + $0x30] sm:$0xff] %v1753_v2  ;;  %1756 = vst [vmem:[%s2574_s7 + $0x38] sm:$0xff] %v1755_v3  ;;  %v1759_v5 = vld [vmem:[%s2578_s14 + $0x48] sm:$0xff]  ;;  %v1761_v6 = vld [vmem:[%s2578_s14 + $0x50] sm:$0xff]  ;;  %s2067_s16 = sshll.u32 %s3273_s15, 8  ;;  %s3266_s21 = smov %s3273_s15 }
 0x2d9   : >> { %1758 = vst [vmem:[%s2574_s7 + $0x40] sm:$0xff] %v1757_v4  ;;  %v1763_v7 = vld [vmem:[%s2578_s14 + $0x58] sm:$0xff]  ;;  %1760 = vst [vmem:[%s2574_s7 + $0x48] sm:$0xff] %v1759_v5  ;;  %v1765_v8 = vld [vmem:[%s2578_s14 + $0x60] sm:$0xff]  ;;  %s3193_s17 = scalar_lea.vmem %s3028_s29, %s2067_s16 [#allocation3]   ;;  %s1811_s18 = scalar_lea.vmem %s3120_s28, %s2067_s16  }
 0x2da   : >> { %1762 = vst [vmem:[%s2574_s7 + $0x50] sm:$0xff] %v1761_v6  ;;  %1764 = vst [vmem:[%s2574_s7 + $0x58] sm:$0xff] %v1763_v7  ;;  %v1767_v9 = vld [vmem:[%s2578_s14 + $0x68] sm:$0xff]  ;;  %v1769_v10 = vld [vmem:[%s2578_s14 + $0x70] sm:$0xff] }
 0x2db   : >> { %1766 = vst [vmem:[%s2574_s7 + $0x60] sm:$0xff] %v1765_v8  ;;  %1768 = vst [vmem:[%s2574_s7 + $0x68] sm:$0xff] %v1767_v9  ;;  %v1771_v11 = vld [vmem:[%s2578_s14 + $0x78] sm:$0xff]  ;;  %v1773_v12 = vld [vmem:[%s2578_s14 + $0x80] sm:$0xff] }
 0x2dc   : >> { %1770 = vst [vmem:[%s2574_s7 + $0x70] sm:$0xff] %v1769_v10  ;;  %v1775_v13 = vld [vmem:[%s2578_s14 + $0x88] sm:$0xff]  ;;  %1772 = vst [vmem:[%s2574_s7 + $0x78] sm:$0xff] %v1771_v11  ;;  %v1777_v14 = vld [vmem:[%s2578_s14 + $0x90] sm:$0xff] }
 0x2dd   : >> { %1774 = vst [vmem:[%s2574_s7 + $0x80] sm:$0xff] %v1773_v12  ;;  %1776 = vst [vmem:[%s2574_s7 + $0x88] sm:$0xff] %v1775_v13  ;;  %v1779_v15 = vld [vmem:[%s2578_s14 + $0x98] sm:$0xff]  ;;  %v1781_v16 = vld [vmem:[%s2578_s14 + $0xa0] sm:$0xff] }
 0x2de   : >> { %1778 = vst [vmem:[%s2574_s7 + $0x90] sm:$0xff] %v1777_v14  ;;  %1780 = vst [vmem:[%s2574_s7 + $0x98] sm:$0xff] %v1779_v15  ;;  %v1783_v17 = vld [vmem:[%s2578_s14 + $0xa8] sm:$0xff]  ;;  %v1785_v18 = vld [vmem:[%s2578_s14 + $0xb0] sm:$0xff]  ;;  %1737 = sbr.rel (!%p1734_p12) target bundleno = 724 (0x2d4), region = 145 }
 0x2df   : >> { %1782 = vst [vmem:[%s2574_s7 + $0xa0] sm:$0xff] %v1781_v16  ;;  %v1787_v19 = vld [vmem:[%s2578_s14 + $0xb8] sm:$0xff]  ;;  %1784 = vst [vmem:[%s2574_s7 + $0xa8] sm:$0xff] %v1783_v17  ;;  %v1789_v20 = vld [vmem:[%s2578_s14 + $0xc0] sm:$0xff] }
 0x2e0   : >> { %1786 = vst [vmem:[%s2574_s7 + $0xb0] sm:$0xff] %v1785_v18  ;;  %1788 = vst [vmem:[%s2574_s7 + $0xb8] sm:$0xff] %v1787_v19  ;;  %v1791_v22 = vld [vmem:[%s2578_s14 + $0xc8] sm:$0xff]  ;;  %v1793_v23 = vld [vmem:[%s2578_s14 + $0xd0] sm:$0xff] }
 0x2e1   : >> { %1790 = vst [vmem:[%s2574_s7 + $0xc0] sm:$0xff] %v1789_v20  ;;  %1792 = vst [vmem:[%s2574_s7 + $0xc8] sm:$0xff] %v1791_v22  ;;  %v1795_v24 = vld [vmem:[%s2578_s14 + $0xd8] sm:$0xff]  ;;  %v1797_v44 = vld [vmem:[%s2578_s14 + $0xe0] sm:$0xff] }
 0x2e2   : >> { %1794 = vst [vmem:[%s2574_s7 + $0xd0] sm:$0xff] %v1793_v23  ;;  %v1799_v26 = vld [vmem:[%s2578_s14 + $0xe8] sm:$0xff]  ;;  %1796 = vst [vmem:[%s2574_s7 + $0xd8] sm:$0xff] %v1795_v24  ;;  %v1801_v27 = vld [vmem:[%s2578_s14 + $0xf0] sm:$0xff] }
 0x2e3   : >> { %1798 = vst [vmem:[%s2574_s7 + $0xe0] sm:$0xff] %v1797_v44  ;;  %1800 = vst [vmem:[%s2574_s7 + $0xe8] sm:$0xff] %v1799_v26  ;;  %v1803_v28 = vld [vmem:[%s2578_s14 + $0xf8] sm:$0xff]  ;;  %s3265_s14 = smov %s3193_s17 }
 0x2e4   : >> { %1802 = vst [vmem:[%s2574_s7 + $0xf0] sm:$0xff] %v1801_v27  ;;  %1804 = vst [vmem:[%s2574_s7 + $0xf8] sm:$0xff] %v1803_v28  ;;  %s3264_s7 = smov %s1811_s18 }
 0x2e5 PF: > { %s3234_s19 = sand.u32 31, %s3271_s24   ;;  %s2078_s20 = sshll.u32 %s3126_s11, 8 }
 0x2e6   : > { %s1816_s22 = scalar_lea.vmem %s3028_s29, %s2078_s20 [#allocation3]   ;;  %s1818_s23 = scalar_lea.vmem %s3120_s28, %s2078_s20  }
 0x2e7   : > { %p2072_p13 = scmp.le.s32.totalorder %s3234_s19, 0 }
 0x2e8   : > { %s2588_s25 = smov (!%p2072_p13), %s1818_s23   ;;  %s2592_s26 = smov (!%p2072_p13), %s1816_s22  }
 0x2e9   : > { %1915 = sbr.rel (%p2072_p13) target bundleno = 762 (0x2fa), region = 150  ;;  %s2596_s27 = smov (!%p2072_p13), 0  }
 0x2ea   : > { %s2600_s9 = smov (!%p2072_p13), 0  }
 0x2f0 LB: >> { %v1828_v29 = vld [vmem:[%s2594_s26] sm:$0xff]  ;;  %s1830_s24 = sadd.s32 1, %s2598_s27  ;;  %s1822_s9 = sadd.s32 1, %s2602_s9   ;;  %s2602_s9 = sphi %s2600_s9, %s1822_s9   ;;  %s2598_s27 = sphi %s2596_s27, %s2597_s27   ;;  %s2594_s26 = sphi %s2592_s26, %s1835_s26   ;;  %s2590_s25 = sphi %s2588_s25, %s1836_s25  }
 0x2f1   : >> { %1829 = vst [vmem:[%s2590_s25] sm:$0xff] %v1828_v29  ;;  %p1831_p0 = scmp.ge.s32.totalorder %s1830_s24, %s3234_s19  ;;  %p1821_p1 = scmp.ge.s32.totalorder %s1822_s9, %s3234_s19 }
 0x2f3   : >> { %s3275_s24 = smov (%p1831_p0, %s1830_s24), 0  ;;  %1824 = sbr.rel (!%p1821_p1) target bundleno = 752 (0x2f0), region = 156 }
 0x2f4   : >> { %s2073_s29 = sshll.u32 %s3275_s24, 3  ;;  %s2597_s27 = smov %s3275_s24  }
 0x2f5   : >> { %s1835_s26 = scalar_lea.vmem %s1816_s22, %s2073_s29 [#allocation3]   ;;  %s1836_s25 = scalar_lea.vmem %s1818_s23, %s2073_s29  }
 0x2fa PF: > { %p17_p2 = scmp.ge.s32.totalorder %s2667_s10, 6   ;;  %s3267_s29 = smov %s2566_s30 }
 0x2fb   : > { %s3268_s30 = smov %s2675_s13  ;;  %s3269_s9 = smov %s2667_s10 }
 0x2fc   :  { %19 = sbr.rel (!%p17_p2) target bundleno = 5 (0x5), region = 167 }

</bundles_post_ra>
